<compile_context>
chip_gen: v7x
topology: tpu7x:2x2x1
jax: 0.10.0
libtpu: 0.0.40
codegen_flags: <defaults>
</compile_context>

<pallas_src>
import functools

import jax
import jax.numpy as jnp
from jax import lax
from jax.experimental import pallas as pl
from jax.experimental.pallas import tpu as pltpu

# direction table (identical ordering to the PyTorch reference):
#   | 4| 0| 5|
#   | 2| 8| 3|
#   | 6| 1| 7|
_X_RANGE = (1, -1, 0, 0, -1, 1, -1, 1, 0)   # row (H) offsets
_Y_RANGE = (0, 0, -1, 1, 1, 1, -1, -1, 0)   # col (W) offsets
_DIRS = tuple(zip(_X_RANGE, _Y_RANGE))

_MAX_DIS = 1.0e5        # padding value for out-of-image distances (as in reference)
_ROW_INF = 1.0e6        # "no boundary in this row" sentinel for the 1-D pass
_SQ_INF = 4.0e12        # init value for the squared-distance envelope pass
_MAX_CLIP_DIST = 20.0   # max_clip_dist of the module
_NBINS = 512            # log-spaced bins for the adaptive-eps selection
_VMEM_LIMIT = 48 * 1024 * 1024   # <= v7x physical 64 MiB, well under v5e/v6e 128 MiB


def _pick_tile_h(H):
    """Largest row tile that divides H, is a multiple of 8 and keeps blocks small."""
    for th in range(min(64, H // 2), 7, -1):
        if H % th == 0 and th % 8 == 0:
            return th
    return H   # fall back to whole-image rows (block == full dim is always legal)


def _params(ndims):
    return pltpu.CompilerParams(
        dimension_semantics=("parallel",) * ndims,
        vmem_limit_bytes=_VMEM_LIMIT)


def _log_softmax_c0(x):
    """log-softmax over axis 0 (channels). The channel axis is NOT the lane axis, so
    the reductions are elementwise VPU ops across C vreg slabs (no XLU)."""
    m = jnp.max(x, axis=0, keepdims=True)
    s = x - m
    return s - jnp.log(jnp.sum(jnp.exp(s), axis=0, keepdims=True))


# ----------------------------------------------------------------------------
# Kernel 1: exact Euclidean distance transform of the GT boundary.
# dist_map[p] = max(dist_to_nearest_boundary_pixel(p) - 1, 0)
# Separable exact EDT: (1) exact 1-D row distance via log2(W) min-plus doubling
# steps, (2) squared-distance envelope over rows via a fori_loop of length H.
# ----------------------------------------------------------------------------
def _dist_kernel(bnd_ref, out_ref, g_ref):
    bnd = bnd_ref[0]                                    # (H, W) in {0, 1}
    H, W = bnd.shape

    # pass 1: d[a, j] = min_b { |j - b| : bnd[a, b] == 1 }   (exact, O(H W log W))
    d = jnp.where(bnd > 0.5, 0.0, _ROW_INF).astype(jnp.float32)
    s = 1
    while s < W:                                        # trace-time loop, log2(W) steps
        inf_blk = jnp.full((H, s), _ROW_INF, jnp.float32)
        left = jnp.concatenate([inf_blk, d[:, :W - s]], axis=1)    # d[j - s]
        right = jnp.concatenate([d[:, s:], inf_blk], axis=1)       # d[j + s]
        d = jnp.minimum(d, jnp.minimum(left, right) + float(s))
        s *= 2
    g_ref[...] = d * d                                  # squared row distance

    # pass 2: dist^2[i, j] = min_a ((i - a)^2 + g[a, j])   (exact separable EDT)
    ii = lax.broadcasted_iota(jnp.int32, (H, 1), 0).astype(jnp.float32)

    def body(a, best):
        af = a.astype(jnp.float32)
        return jnp.minimum(best, (ii - af) ** 2 + g_ref[pl.ds(a, 1), :])

    best = lax.fori_loop(0, H, body, jnp.full((H, W), _SQ_INF, jnp.float32))
    out_ref[0] = jnp.maximum(jnp.sqrt(best) - 1.0, 0.0)


# ----------------------------------------------------------------------------
# Kernel 2: logits2boundary KL map: KL(p || p_down) + KL(p || p_right) per pixel.
# Input is a replicate-halo window (C, TH+2, W+2); a single shared log-softmax is
# computed and the down/right neighbors are static slices of it.  The replicate
# halo makes the KL exactly 0 on the global last row/column (matches reference pad).
# ----------------------------------------------------------------------------
def _kl_boundary_kernel(lpad_ref, out_ref):
    x = lpad_ref[0].astype(jnp.float32)                 # (C, TH+2, W+2)
    th, w = out_ref.shape[1], out_ref.shape[2]
    lsm = _log_softmax_c0(x)                            # one softmax for all 3 views
    lsm_c = lsm[:, 1:1 + th, 1:1 + w]
    p_c = jnp.exp(lsm_c)
    kl_ud = jnp.sum(p_c * (lsm_c - lsm[:, 2:2 + th, 1:1 + w]), axis=0)   # down
    kl_lr = jnp.sum(p_c * (lsm_c - lsm[:, 1:1 + th, 2:2 + w]), axis=0)   # right
    out_ref[0] = kl_ud + kl_lr


# ----------------------------------------------------------------------------
# Kernel 3: 3x3 all-ones dilation (padding=1) as 9 shifted adds of a zero-halo window.
# ----------------------------------------------------------------------------
def _dilate_kernel(xpad_ref, out_ref):
    x = xpad_ref[0]                                     # (TH+2, W+2), zero halo
    th, w = out_ref.shape[1], out_ref.shape[2]
    acc = x[0:th, 0:w]
    for di in range(3):
        for dj in range(3):
            if di == 0 and dj == 0:
                continue
            acc = acc + x[di:di + th, dj:dj + w]
    out_ref[0] = (acc > 0.0).astype(jnp.float32)


# ----------------------------------------------------------------------------
# Kernel 4: per-pixel direction loss.  One shared log-softmax / softmax over the
# halo window; the 8 neighbor KL "logits" are static slices; the cross entropy is a
# streaming online-logsumexp loop (few live (TH,W) accumulators, no 8-map stack).
# ----------------------------------------------------------------------------
def _direction_kernel(lpad_ref, dpad_ref, pb_ref, contrib_ref, mask_ref):
    x = lpad_ref[0].astype(jnp.float32)                 # (C, TH+2, W+2) replicate halo
    dpad = dpad_ref[0]                                  # (TH+2, W+2)    1e5 halo
    pb = pb_ref[0]                                      # (TH, W)        predicted boundary
    th, w = pb.shape

    lsm = _log_softmax_c0(x)                            # single softmax pass
    p = jnp.exp(lsm)                                    # single exp pass
    lsm_c = lsm[:, 1:1 + th, 1:1 + w]

    # direction ground truth: argmin over the 9 neighbor distances (first min wins,
    # like torch.argmin).
    def dist_view(k):
        dx, dy = _DIRS[k]
        return dpad[1 + dx:1 + dx + th, 1 + dy:1 + dy + w]

    best_val = dist_view(0)
    best_idx = jnp.zeros((th, w), jnp.int32)
    for k in range(1, 9):
        dk = dist_view(k)
        upd = dk < best_val
        best_idx = jnp.where(upd, jnp.int32(k), best_idx)
        best_val = jnp.where(upd, dk, best_val)

    # streaming cross entropy of the 8 KL "logits" against the argmin direction.
    def kl_view(k):
        dx, dy = _DIRS[k]
        lsm_n = lsm[:, 1 + dx:1 + dx + th, 1 + dy:1 + dy + w]
        p_n = p[:, 1 + dx:1 + dx + th, 1 + dy:1 + dy + w]
        return jnp.sum(p_n * (lsm_n - lsm_c), axis=0)

    kl0 = kl_view(0)
    m = kl0
    ssum = jnp.ones((th, w), jnp.float32)
    sel = jnp.where(best_idx == 0, kl0, 0.0)
    for k in range(1, 8):
        klk = kl_view(k)
        m_new = jnp.maximum(m, klk)
        ssum = ssum * jnp.exp(m - m_new) + jnp.exp(klk - m_new)
        sel = sel + jnp.where(best_idx == k, klk, 0.0)
        m = m_new
    ce = (m + jnp.log(ssum)) - sel

    d_center = dpad[1:1 + th, 1:1 + w]
    weight = jnp.minimum(d_center, _MAX_CLIP_DIST) * (1.0 / _MAX_CLIP_DIST)
    mask = pb * (best_idx != 8).astype(jnp.float32)

    contrib_ref[0] = ce * weight * mask
    mask_ref[0] = mask


# ----------------------------------------------------------------------------
# pallas_call wrappers
# ----------------------------------------------------------------------------
def _dist_transform(bnd):
    B, H, W = bnd.shape
    return pl.pallas_call(
        _dist_kernel,
        out_shape=jax.ShapeDtypeStruct((B, H, W), jnp.float32),
        grid=(B,),
        in_specs=[pl.BlockSpec((1, H, W), lambda b: (b, 0, 0))],
        out_specs=pl.BlockSpec((1, H, W), lambda b: (b, 0, 0)),
        scratch_shapes=[pltpu.VMEM((H, W), jnp.float32)],
        compiler_params=_params(1),
    )(bnd)


def _kl_boundary(lpad_t, B, nT, TH, W, C):
    THP, WP = TH + 2, W + 2
    H = nT * TH
    return pl.pallas_call(
        _kl_boundary_kernel,
        out_shape=jax.ShapeDtypeStruct((B, H, W), jnp.float32),
        grid=(B, nT),
        in_specs=[pl.BlockSpec((1, C, THP, WP), lambda b, t: (b * nT + t, 0, 0, 0))],
        out_specs=pl.BlockSpec((1, TH, W), lambda b, t: (b, t, 0)),
        compiler_params=_params(2),
    )(lpad_t)


def _dilate(kb_t, B, nT, TH, W):
    THP, WP = TH + 2, W + 2
    H = nT * TH
    return pl.pallas_call(
        _dilate_kernel,
        out_shape=jax.ShapeDtypeStruct((B, H, W), jnp.float32),
        grid=(B, nT),
        in_specs=[pl.BlockSpec((1, THP, WP), lambda b, t: (b * nT + t, 0, 0))],
        out_specs=pl.BlockSpec((1, TH, W), lambda b, t: (b, t, 0)),
        compiler_params=_params(2),
    )(kb_t)


def _direction_loss(lpad_t, dpad_t, pred_bnd, B, nT, TH, W, C):
    THP, WP = TH + 2, W + 2
    H = nT * TH
    out3 = pl.BlockSpec((1, TH, W), lambda b, t: (b, t, 0))
    return pl.pallas_call(
        _direction_kernel,
        out_shape=(jax.ShapeDtypeStruct((B, H, W), jnp.float32),
                   jax.ShapeDtypeStruct((B, H, W), jnp.float32)),
        grid=(B, nT),
        in_specs=[pl.BlockSpec((1, C, THP, WP), lambda b, t: (b * nT + t, 0, 0, 0)),
                  pl.BlockSpec((1, THP, WP), lambda b, t: (b * nT + t, 0, 0)),
                  pl.BlockSpec((1, TH, W), lambda b, t: (b, t, 0))],
        out_specs=(out3, out3),
        compiler_params=_params(2),
    )(lpad_t, dpad_t, pred_bnd)


def _row_windows(x, TH):
    """(B, ..., H+2, Wp) -> (B*nT, ..., TH+2, Wp): overlapping row windows (1-px halo).
    Duplication is only 2 rows per TH (<2% at realistic tiles) so standard Blocked
    BlockSpecs can be used with full auto-pipelining."""
    Hp = x.shape[-2]
    H = Hp - 2
    nT = H // TH
    if nT == 1:
        return x
    wins = [lax.slice_in_dim(x, t * TH, t * TH + TH + 2, axis=x.ndim - 2)
            for t in range(nT)]
    stacked = jnp.stack(wins, axis=1)
    return stacked.reshape((x.shape[0] * nT,) + stacked.shape[2:])


# ----------------------------------------------------------------------------
# Full forward (ABL with label_smoothing=0, weight=None, max_clip_dist=20).
# ----------------------------------------------------------------------------
@functools.partial(jax.jit, static_argnames=("ignore_label", "max_N_ratio"))
def _abl_forward(logits_nchw, target, ignore_label=255, max_N_ratio=1.0 / 100.0):
    B, C, H, W = logits_nchw.shape
    # NCHW kept as-is (W on lanes, C leading). Logits dtype is kept (bf16 stays bf16
    # in HBM for half the DMA bytes); kernels upcast to f32 before softmax/exp.
    logits = logits_nchw
    target = target.astype(jnp.int32)

    # --- gt2boundary (glue: integer diffs / pads) ---
    ud = jnp.pad(target[:, 1:, :] - target[:, :-1, :], ((0, 0), (0, 1), (0, 0))) != 0
    lr = jnp.pad(target[:, :, 1:] - target[:, :, :-1], ((0, 0), (0, 0), (0, 1))) != 0
    gt_bnd = (ud | lr | (target == ignore_label)).astype(jnp.float32)

    # --- Pallas: exact distance transform of the gt boundary ---
    dist_map = _dist_transform(gt_bnd)                                     # (B, H, W)
    # TODO(synk): an image with no GT boundary at all yields huge distances here,
    #             whereas the reference's scipy path returns an all-zero map.

    TH = _pick_tile_h(H)
    nT = H // TH

    # --- 1-pixel halos, materialized once; neighbor views are in-kernel slices ---
    lpad = jnp.pad(logits, ((0, 0), (0, 0), (1, 1), (1, 1)), mode="edge")
    dpad = jnp.pad(dist_map, ((0, 0), (1, 1), (1, 1)), constant_values=_MAX_DIS)
    lpad_t = _row_windows(lpad, TH)                      # (B*nT, C, TH+2, W+2)
    dpad_t = _row_windows(dpad, TH)                      # (B*nT, TH+2, W+2)

    # --- Pallas: KL boundary map (shared softmax; down/right are in-kernel slices) ---
    kl_combine = _kl_boundary(lpad_t, B, nT, TH, W, C)                     # (B, H, W)

    # --- adaptive eps: one-pass log-histogram (eps_k = 1e-5 * 1.2^k) instead of a
    #     multi-pass while loop; picks the smallest k with count(kl > eps_k) <= max_N.
    max_N = H * W * max_N_ratio
    eps0 = jnp.float32(1e-5)
    log_ratio = jnp.log(jnp.float32(1.2))
    kl_flat = kl_combine.reshape(-1)
    t_idx = jnp.ceil(jnp.log(jnp.maximum(kl_flat, eps0) / eps0) / log_ratio)
    t_idx = jnp.clip(t_idx, 0, _NBINS - 1).astype(jnp.int32)
    hist = jnp.bincount(t_idx, length=_NBINS)
    exceed = kl_flat.shape[0] - jnp.cumsum(hist)         # exceed[k] = count(kl > eps_k)
    k_star = jnp.argmax(exceed <= max_N)                 # first k meeting the stop cond
    eps = eps0 * jnp.exp(k_star.astype(jnp.float32) * log_ratio)
    kl_bin = (kl_combine > eps).astype(jnp.float32)

    # --- Pallas: 3x3 dilation as shift-and-add on a zero-halo window ---
    kb_t = _row_windows(jnp.pad(kl_bin, ((0, 0), (1, 1), (1, 1))), TH)
    pred_bnd = _dilate(kb_t, B, nT, TH, W)                                 # (B, H, W)

    # --- Pallas: direction CE, distance-weighted and boundary-masked ---
    contrib, mask = _direction_loss(lpad_t, dpad_t, pred_bnd, B, nT, TH, W, C)

    n_bound = jnp.sum(pred_bnd)
    n_sel = jnp.sum(mask)
    loss = jnp.sum(contrib) / n_sel      # mean over selected pixels (NaN if empty, like torch)
    return loss, n_bound


def abl_loss(logits, target, ignore_label=255):
    """ABL.forward.  Returns (loss, valid) device scalars (no host sync).

    The reference returns None when there is no predicted boundary; here `valid`
    carries that condition and `loss` is forced to 0.0 in the invalid case, so the
    caller can resolve it without blocking device->host inside the step.
    """
    # TODO(synk): F.interpolate bilinear resize (logit spatial != target spatial)
    #             is not implemented; shapes must already match.
    assert logits.shape[2:] == target.shape[1:]
    loss, n_bound = _abl_forward(logits, target, ignore_label=ignore_label)
    valid = n_bound >= 1.0
    loss = jnp.where(valid, loss, 0.0)
    return loss, valid


if __name__ == "__main__":
    B, C, H, W = 2, 4, 16, 16
    key = jax.random.PRNGKey(0)
    logits = jax.random.normal(key, (B, C, H, W), dtype=jnp.float32)

    # Deterministic 4-quadrant label maps (second batch item shifted).
    row = jnp.arange(H)[:, None]
    col = jnp.arange(W)[None, :]
    quad = (row // (H // 2)) * 2 + (col // (W // 2))
    target = jnp.stack([quad, jnp.roll(quad, 3, axis=1)], axis=0).astype(jnp.int32)

    loss, valid = abl_loss(logits, target)
    jax.block_until_ready((loss, valid))
    print("KERNEL_OK")
</pallas_src>

<mosaic_0001>
module attributes {stable_mosaic.version = 11 : i64} {
  func.func private @main(%arg0: i32) attributes {dimension_semantics = [#tpu.dimension_semantics<core_parallel>], iteration_bounds = array<i64: 2>, tpu.core_type = #tpu.core_type<sc_scalar_subcore>, window_params = []} {
    return
  }
}

module attributes {stable_mosaic.version = 11 : i64} {
  func.func private @main(%arg0: i32) attributes {dimension_semantics = [#tpu.dimension_semantics<core_parallel>], iteration_bounds = array<i64: 2>, tpu.core_type = #tpu.core_type<sc_scalar_subcore>, window_params = []} {
    return
  }
}

module attributes {stable_mosaic.version = 11 : i64} {
  func.func @_dist_kernel(%arg0: i32, %arg1: memref<1x16x16xf32, #tpu.memory_space<vmem>>, %arg2: memref<1x16x16xf32, #tpu.memory_space<vmem>>, %arg3: memref<16x16xf32, #tpu.memory_space<vmem>>) attributes {dimension_semantics = [#tpu.dimension_semantics<parallel>], iteration_bounds = array<i64: 2>, scalar_prefetch = 0 : i64, scratch_operands = 1 : i64, tpu.core_type = #tpu.core_type<tc>, window_params = [{transform_indices = @transform_0, window_bounds = array<i64: 1, 16, 16>}, {transform_indices = @transform_1, window_bounds = array<i64: 1, 16, 16>}]} {
    %c0 = arith.constant 0 : index
    %c0_0 = arith.constant 0 : index
    %c0_1 = arith.constant 0 : index
    %0 = vector.load %arg1[%c0, %c0_0, %c0_1] : memref<1x16x16xf32, #tpu.memory_space<vmem>>, vector<1x16x16xf32>
    %1 = vector.shape_cast %0 : vector<1x16x16xf32> to vector<16x16xf32>
    %cst = arith.constant 5.000000e-01 : f32
    %2 = vector.broadcast %cst : f32 to vector<16x16xf32>
    %3 = arith.cmpf ogt, %1, %2 : vector<16x16xf32>
    %cst_2 = arith.constant 0.000000e+00 : f32
    %cst_3 = arith.constant 1.000000e+06 : f32
    %4 = vector.broadcast %cst_2 : f32 to vector<16x16xf32>
    %5 = vector.broadcast %cst_3 : f32 to vector<16x16xf32>
    %6 = arith.select %3, %4, %5 : vector<16x16xi1>, vector<16x16xf32>
    %cst_4 = arith.constant 1.000000e+06 : f32
    %7 = vector.broadcast %cst_4 : f32 to vector<16x1xf32>
    %8 = vector.extract_strided_slice %6 {offsets = [0, 0], sizes = [16, 15], strides = [1, 1]} : vector<16x16xf32> to vector<16x15xf32>
    %9 = tpu.concatenate %7, %8 in 1 : vector<16x1xf32>, vector<16x15xf32> -> vector<16x16xf32>
    %10 = vector.extract_strided_slice %6 {offsets = [0, 1], sizes = [16, 15], strides = [1, 1]} : vector<16x16xf32> to vector<16x15xf32>
    %11 = tpu.concatenate %10, %7 in 1 : vector<16x15xf32>, vector<16x1xf32> -> vector<16x16xf32>
    %12 = arith.minimumf %9, %11 : vector<16x16xf32>
    %cst_5 = arith.constant 1.000000e+00 : f32
    %13 = vector.broadcast %cst_5 : f32 to vector<16x16xf32>
    %14 = arith.addf %12, %13 : vector<16x16xf32>
    %15 = arith.minimumf %6, %14 : vector<16x16xf32>
    %cst_6 = arith.constant 1.000000e+06 : f32
    %16 = vector.broadcast %cst_6 : f32 to vector<16x2xf32>
    %17 = vector.extract_strided_slice %15 {offsets = [0, 0], sizes = [16, 14], strides = [1, 1]} : vector<16x16xf32> to vector<16x14xf32>
    %18 = tpu.concatenate %16, %17 in 1 : vector<16x2xf32>, vector<16x14xf32> -> vector<16x16xf32>
    %19 = vector.extract_strided_slice %15 {offsets = [0, 2], sizes = [16, 14], strides = [1, 1]} : vector<16x16xf32> to vector<16x14xf32>
    %20 = tpu.concatenate %19, %16 in 1 : vector<16x14xf32>, vector<16x2xf32> -> vector<16x16xf32>
    %21 = arith.minimumf %18, %20 : vector<16x16xf32>
    %cst_7 = arith.constant 2.000000e+00 : f32
    %22 = vector.broadcast %cst_7 : f32 to vector<16x16xf32>
    %23 = arith.addf %21, %22 : vector<16x16xf32>
    %24 = arith.minimumf %15, %23 : vector<16x16xf32>
    %cst_8 = arith.constant 1.000000e+06 : f32
    %25 = vector.broadcast %cst_8 : f32 to vector<16x4xf32>
    %26 = vector.extract_strided_slice %24 {offsets = [0, 0], sizes = [16, 12], strides = [1, 1]} : vector<16x16xf32> to vector<16x12xf32>
    %27 = tpu.concatenate %25, %26 in 1 : vector<16x4xf32>, vector<16x12xf32> -> vector<16x16xf32>
    %28 = vector.extract_strided_slice %24 {offsets = [0, 4], sizes = [16, 12], strides = [1, 1]} : vector<16x16xf32> to vector<16x12xf32>
    %29 = tpu.concatenate %28, %25 in 1 : vector<16x12xf32>, vector<16x4xf32> -> vector<16x16xf32>
    %30 = arith.minimumf %27, %29 : vector<16x16xf32>
    %cst_9 = arith.constant 4.000000e+00 : f32
    %31 = vector.broadcast %cst_9 : f32 to vector<16x16xf32>
    %32 = arith.addf %30, %31 : vector<16x16xf32>
    %33 = arith.minimumf %24, %32 : vector<16x16xf32>
    %cst_10 = arith.constant 1.000000e+06 : f32
    %34 = vector.broadcast %cst_10 : f32 to vector<16x8xf32>
    %35 = vector.extract_strided_slice %33 {offsets = [0, 0], sizes = [16, 8], strides = [1, 1]} : vector<16x16xf32> to vector<16x8xf32>
    %36 = tpu.concatenate %34, %35 in 1 : vector<16x8xf32>, vector<16x8xf32> -> vector<16x16xf32>
    %37 = vector.extract_strided_slice %33 {offsets = [0, 8], sizes = [16, 8], strides = [1, 1]} : vector<16x16xf32> to vector<16x8xf32>
    %38 = tpu.concatenate %37, %34 in 1 : vector<16x8xf32>, vector<16x8xf32> -> vector<16x16xf32>
    %39 = arith.minimumf %36, %38 : vector<16x16xf32>
    %cst_11 = arith.constant 8.000000e+00 : f32
    %40 = vector.broadcast %cst_11 : f32 to vector<16x16xf32>
    %41 = arith.addf %39, %40 : vector<16x16xf32>
    %42 = arith.minimumf %33, %41 : vector<16x16xf32>
    %43 = arith.mulf %42, %42 : vector<16x16xf32>
    %c0_12 = arith.constant 0 : index
    %c0_13 = arith.constant 0 : index
    %44 = vector.load %arg3[%c0_12, %c0_13] : memref<16x16xf32, #tpu.memory_space<vmem>>, vector<16x16xf32>
    tpu.vector_store %arg3[%c0_12, %c0_13], %43 {strides = array<i32>} : memref<16x16xf32, #tpu.memory_space<vmem>>, vector<16x16xf32>,
    %45 = tpu.iota {dimensions = array<i32: 0>} : vector<16x1xi32>
    %46 = arith.sitofp %45 : vector<16x1xi32> to vector<16x1xf32>
    %cst_14 = arith.constant 4.000000e+12 : f32
    %47 = vector.broadcast %cst_14 : f32 to vector<16x16xf32>
    %c0_i32 = arith.constant 0 : i32
    %c16_i32 = arith.constant 16 : i32
    %48 = arith.addi %c0_i32, %c16_i32 : i32
    %c1_i32 = arith.constant 1 : i32
    %49 = scf.for %arg4 = %c0_i32 to %48 step %c1_i32 iter_args(%arg5 = %47) -> (vector<16x16xf32>)  : i32 {
      %58 = arith.sitofp %arg4 : i32 to f32
      %59 = vector.broadcast %58 : f32 to vector<16x1xf32>
      %60 = arith.subf %46, %59 : vector<16x1xf32>
      %61 = arith.mulf %60, %60 : vector<16x1xf32>
      %62 = arith.index_cast %arg4 : i32 to index
      %c0_21 = arith.constant 0 : index
      %63 = vector.load %arg3[%62, %c0_21] : memref<16x16xf32, #tpu.memory_space<vmem>>, vector<1x16xf32>
      %64 = vector.broadcast %61 : vector<16x1xf32> to vector<16x16xf32>
      %65 = vector.broadcast %63 : vector<1x16xf32> to vector<16x16xf32>
      %66 = arith.addf %64, %65 : vector<16x16xf32>
      %67 = arith.minimumf %arg5, %66 : vector<16x16xf32>
      scf.yield %67 : vector<16x16xf32>
    }
    %c16_i32_15 = arith.constant 16 : i32
    %50 = math.sqrt %49 : vector<16x16xf32>
    %cst_16 = arith.constant 1.000000e+00 : f32
    %51 = vector.broadcast %cst_16 : f32 to vector<16x16xf32>
    %52 = arith.subf %50, %51 : vector<16x16xf32>
    %cst_17 = arith.constant 0.000000e+00 : f32
    %53 = vector.broadcast %cst_17 : f32 to vector<16x16xf32>
    %54 = arith.maximumf %52, %53 : vector<16x16xf32>
    %c0_18 = arith.constant 0 : index
    %c0_19 = arith.constant 0 : index
    %c0_20 = arith.constant 0 : index
    %55 = vector.load %arg2[%c0_18, %c0_19, %c0_20] : memref<1x16x16xf32, #tpu.memory_space<vmem>>, vector<1x16x16xf32>
    %56 = vector.shape_cast %55 : vector<1x16x16xf32> to vector<16x16xf32>
    %57 = vector.shape_cast %54 : vector<16x16xf32> to vector<1x16x16xf32>
    tpu.vector_store %arg2[%c0_18, %c0_19, %c0_20], %57 {strides = array<i32>} : memref<1x16x16xf32, #tpu.memory_space<vmem>>, vector<1x16x16xf32>,
    return
  }
  func.func @transform_0(%arg0: i32) -> (i32, i32, i32) {
    %c0_i32 = arith.constant 0 : i32
    %c0_i32_0 = arith.constant 0 : i32
    %c0_i32_1 = arith.constant 0 : i32
    return %arg0, %c0_i32, %c0_i32_0 : i32, i32, i32
  }
  func.func @transform_1(%arg0: i32) -> (i32, i32, i32) {
    %c0_i32 = arith.constant 0 : i32
    %c0_i32_0 = arith.constant 0 : i32
    %c0_i32_1 = arith.constant 0 : i32
    return %arg0, %c0_i32, %c0_i32_0 : i32, i32, i32
  }
}

module attributes {stable_mosaic.version = 11 : i64} {
  func.func @_kl_boundary_kernel(%arg0: i32, %arg1: i32, %arg2: memref<1x4x10x18xf32, #tpu.memory_space<vmem>>, %arg3: memref<1x8x16xf32, #tpu.memory_space<vmem>>) attributes {dimension_semantics = [#tpu.dimension_semantics<parallel>, #tpu.dimension_semantics<parallel>], iteration_bounds = array<i64: 2, 2>, scalar_prefetch = 0 : i64, scratch_operands = 0 : i64, tpu.core_type = #tpu.core_type<tc>, window_params = [{transform_indices = @transform_0, window_bounds = array<i64: 1, 4, 10, 18>}, {transform_indices = @transform_1, window_bounds = array<i64: 1, 8, 16>}]} {
    %c0 = arith.constant 0 : index
    %c0_0 = arith.constant 0 : index
    %c0_1 = arith.constant 0 : index
    %c0_2 = arith.constant 0 : index
    %0 = vector.load %arg2[%c0, %c0_0, %c0_1, %c0_2] : memref<1x4x10x18xf32, #tpu.memory_space<vmem>>, vector<1x4x10x18xf32>
    %1 = vector.shape_cast %0 : vector<1x4x10x18xf32> to vector<4x10x18xf32>
    %cst = arith.constant dense<0xFF800000> : vector<10x18xf32>
    %2 = vector.multi_reduction <maximumf>, %1, %cst [0] : vector<4x10x18xf32> to vector<10x18xf32>
    %3 = vector.shape_cast %2 : vector<10x18xf32> to vector<1x10x18xf32>
    %4 = vector.broadcast %3 : vector<1x10x18xf32> to vector<4x10x18xf32>
    %5 = arith.subf %1, %4 : vector<4x10x18xf32>
    %6 = math.exp %5 : vector<4x10x18xf32>
    %cst_3 = arith.constant dense<0.000000e+00> : vector<10x18xf32>
    %7 = vector.multi_reduction <add>, %6, %cst_3 [0] : vector<4x10x18xf32> to vector<10x18xf32>
    %8 = vector.shape_cast %7 : vector<10x18xf32> to vector<1x10x18xf32>
    %9 = math.log %8 : vector<1x10x18xf32>
    %10 = vector.broadcast %9 : vector<1x10x18xf32> to vector<4x10x18xf32>
    %11 = arith.subf %5, %10 : vector<4x10x18xf32>
    %12 = vector.extract_strided_slice %11 {offsets = [0, 1, 1], sizes = [4, 8, 16], strides = [1, 1, 1]} : vector<4x10x18xf32> to vector<4x8x16xf32>
    %13 = math.exp %12 : vector<4x8x16xf32>
    %14 = vector.extract_strided_slice %11 {offsets = [0, 2, 1], sizes = [4, 8, 16], strides = [1, 1, 1]} : vector<4x10x18xf32> to vector<4x8x16xf32>
    %15 = arith.subf %12, %14 : vector<4x8x16xf32>
    %16 = arith.mulf %13, %15 : vector<4x8x16xf32>
    %cst_4 = arith.constant dense<0.000000e+00> : vector<8x16xf32>
    %17 = vector.multi_reduction <add>, %16, %cst_4 [0] : vector<4x8x16xf32> to vector<8x16xf32>
    %18 = vector.extract_strided_slice %11 {offsets = [0, 1, 2], sizes = [4, 8, 16], strides = [1, 1, 1]} : vector<4x10x18xf32> to vector<4x8x16xf32>
    %19 = arith.subf %12, %18 : vector<4x8x16xf32>
    %20 = arith.mulf %13, %19 : vector<4x8x16xf32>
    %cst_5 = arith.constant dense<0.000000e+00> : vector<8x16xf32>
    %21 = vector.multi_reduction <add>, %20, %cst_5 [0] : vector<4x8x16xf32> to vector<8x16xf32>
    %22 = arith.addf %17, %21 : vector<8x16xf32>
    %c0_6 = arith.constant 0 : index
    %c0_7 = arith.constant 0 : index
    %c0_8 = arith.constant 0 : index
    %23 = vector.load %arg3[%c0_6, %c0_7, %c0_8] : memref<1x8x16xf32, #tpu.memory_space<vmem>>, vector<1x8x16xf32>
    %24 = vector.shape_cast %23 : vector<1x8x16xf32> to vector<8x16xf32>
    %25 = vector.shape_cast %22 : vector<8x16xf32> to vector<1x8x16xf32>
    tpu.vector_store %arg3[%c0_6, %c0_7, %c0_8], %25 {strides = array<i32>} : memref<1x8x16xf32, #tpu.memory_space<vmem>>, vector<1x8x16xf32>,
    return
  }
  func.func @transform_0(%arg0: i32, %arg1: i32) -> (i32, i32, i32, i32) {
    %c2_i32 = arith.constant 2 : i32
    %0 = arith.muli %arg0, %c2_i32 : i32
    %1 = arith.addi %0, %arg1 : i32
    %c0_i32 = arith.constant 0 : i32
    %c0_i32_0 = arith.constant 0 : i32
    %c0_i32_1 = arith.constant 0 : i32
    %c0_i32_2 = arith.constant 0 : i32
    return %1, %c0_i32, %c0_i32_0, %c0_i32_1 : i32, i32, i32, i32
  }
  func.func @transform_1(%arg0: i32, %arg1: i32) -> (i32, i32, i32) {
    %c0_i32 = arith.constant 0 : i32
    %c0_i32_0 = arith.constant 0 : i32
    return %arg0, %arg1, %c0_i32 : i32, i32, i32
  }
}

module attributes {stable_mosaic.version = 11 : i64} {
  func.func @_dilate_kernel(%arg0: i32, %arg1: i32, %arg2: memref<1x10x18xf32, #tpu.memory_space<vmem>>, %arg3: memref<1x8x16xf32, #tpu.memory_space<vmem>>) attributes {dimension_semantics = [#tpu.dimension_semantics<parallel>, #tpu.dimension_semantics<parallel>], iteration_bounds = array<i64: 2, 2>, scalar_prefetch = 0 : i64, scratch_operands = 0 : i64, tpu.core_type = #tpu.core_type<tc>, window_params = [{transform_indices = @transform_0, window_bounds = array<i64: 1, 10, 18>}, {transform_indices = @transform_1, window_bounds = array<i64: 1, 8, 16>}]} {
    %c0 = arith.constant 0 : index
    %c0_0 = arith.constant 0 : index
    %c0_1 = arith.constant 0 : index
    %0 = vector.load %arg2[%c0, %c0_0, %c0_1] : memref<1x10x18xf32, #tpu.memory_space<vmem>>, vector<1x10x18xf32>
    %1 = vector.shape_cast %0 : vector<1x10x18xf32> to vector<10x18xf32>
    %2 = vector.extract_strided_slice %1 {offsets = [0, 0], sizes = [8, 16], strides = [1, 1]} : vector<10x18xf32> to vector<8x16xf32>
    %3 = vector.extract_strided_slice %1 {offsets = [0, 1], sizes = [8, 16], strides = [1, 1]} : vector<10x18xf32> to vector<8x16xf32>
    %4 = arith.addf %2, %3 : vector<8x16xf32>
    %5 = vector.extract_strided_slice %1 {offsets = [0, 2], sizes = [8, 16], strides = [1, 1]} : vector<10x18xf32> to vector<8x16xf32>
    %6 = arith.addf %4, %5 : vector<8x16xf32>
    %7 = vector.extract_strided_slice %1 {offsets = [1, 0], sizes = [8, 16], strides = [1, 1]} : vector<10x18xf32> to vector<8x16xf32>
    %8 = arith.addf %6, %7 : vector<8x16xf32>
    %9 = vector.extract_strided_slice %1 {offsets = [1, 1], sizes = [8, 16], strides = [1, 1]} : vector<10x18xf32> to vector<8x16xf32>
    %10 = arith.addf %8, %9 : vector<8x16xf32>
    %11 = vector.extract_strided_slice %1 {offsets = [1, 2], sizes = [8, 16], strides = [1, 1]} : vector<10x18xf32> to vector<8x16xf32>
    %12 = arith.addf %10, %11 : vector<8x16xf32>
    %13 = vector.extract_strided_slice %1 {offsets = [2, 0], sizes = [8, 16], strides = [1, 1]} : vector<10x18xf32> to vector<8x16xf32>
    %14 = arith.addf %12, %13 : vector<8x16xf32>
    %15 = vector.extract_strided_slice %1 {offsets = [2, 1], sizes = [8, 16], strides = [1, 1]} : vector<10x18xf32> to vector<8x16xf32>
    %16 = arith.addf %14, %15 : vector<8x16xf32>
    %17 = vector.extract_strided_slice %1 {offsets = [2, 2], sizes = [8, 16], strides = [1, 1]} : vector<10x18xf32> to vector<8x16xf32>
    %18 = arith.addf %16, %17 : vector<8x16xf32>
    %cst = arith.constant 0.000000e+00 : f32
    %19 = vector.broadcast %cst : f32 to vector<8x16xf32>
    %20 = arith.cmpf ogt, %18, %19 : vector<8x16xf32>
    %21 = arith.extui %20 : vector<8x16xi1> to vector<8x16xi32>
    %22 = arith.sitofp %21 : vector<8x16xi32> to vector<8x16xf32>
    %c0_2 = arith.constant 0 : index
    %c0_3 = arith.constant 0 : index
    %c0_4 = arith.constant 0 : index
    %23 = vector.load %arg3[%c0_2, %c0_3, %c0_4] : memref<1x8x16xf32, #tpu.memory_space<vmem>>, vector<1x8x16xf32>
    %24 = vector.shape_cast %23 : vector<1x8x16xf32> to vector<8x16xf32>
    %25 = vector.shape_cast %22 : vector<8x16xf32> to vector<1x8x16xf32>
    tpu.vector_store %arg3[%c0_2, %c0_3, %c0_4], %25 {strides = array<i32>} : memref<1x8x16xf32, #tpu.memory_space<vmem>>, vector<1x8x16xf32>,
    return
  }
  func.func @transform_0(%arg0: i32, %arg1: i32) -> (i32, i32, i32) {
    %c2_i32 = arith.constant 2 : i32
    %0 = arith.muli %arg0, %c2_i32 : i32
    %1 = arith.addi %0, %arg1 : i32
    %c0_i32 = arith.constant 0 : i32
    %c0_i32_0 = arith.constant 0 : i32
    %c0_i32_1 = arith.constant 0 : i32
    return %1, %c0_i32, %c0_i32_0 : i32, i32, i32
  }
  func.func @transform_1(%arg0: i32, %arg1: i32) -> (i32, i32, i32) {
    %c0_i32 = arith.constant 0 : i32
    %c0_i32_0 = arith.constant 0 : i32
    return %arg0, %arg1, %c0_i32 : i32, i32, i32
  }
}

module attributes {stable_mosaic.version = 11 : i64} {
  func.func @_direction_kernel(%arg0: i32, %arg1: i32, %arg2: memref<1x4x10x18xf32, #tpu.memory_space<vmem>>, %arg3: memref<1x10x18xf32, #tpu.memory_space<vmem>>, %arg4: memref<1x8x16xf32, #tpu.memory_space<vmem>>, %arg5: memref<1x8x16xf32, #tpu.memory_space<vmem>>, %arg6: memref<1x8x16xf32, #tpu.memory_space<vmem>>) attributes {dimension_semantics = [#tpu.dimension_semantics<parallel>, #tpu.dimension_semantics<parallel>], iteration_bounds = array<i64: 2, 2>, scalar_prefetch = 0 : i64, scratch_operands = 0 : i64, tpu.core_type = #tpu.core_type<tc>, window_params = [{transform_indices = @transform_0, window_bounds = array<i64: 1, 4, 10, 18>}, {transform_indices = @transform_1, window_bounds = array<i64: 1, 10, 18>}, {transform_indices = @transform_2, window_bounds = array<i64: 1, 8, 16>}, {transform_indices = @transform_3, window_bounds = array<i64: 1, 8, 16>}, {transform_indices = @transform_4, window_bounds = array<i64: 1, 8, 16>}]} {
    %c0 = arith.constant 0 : index
    %c0_0 = arith.constant 0 : index
    %c0_1 = arith.constant 0 : index
    %c0_2 = arith.constant 0 : index
    %0 = vector.load %arg2[%c0, %c0_0, %c0_1, %c0_2] : memref<1x4x10x18xf32, #tpu.memory_space<vmem>>, vector<1x4x10x18xf32>
    %1 = vector.shape_cast %0 : vector<1x4x10x18xf32> to vector<4x10x18xf32>
    %c0_3 = arith.constant 0 : index
    %c0_4 = arith.constant 0 : index
    %c0_5 = arith.constant 0 : index
    %2 = vector.load %arg3[%c0_3, %c0_4, %c0_5] : memref<1x10x18xf32, #tpu.memory_space<vmem>>, vector<1x10x18xf32>
    %3 = vector.shape_cast %2 : vector<1x10x18xf32> to vector<10x18xf32>
    %c0_6 = arith.constant 0 : index
    %c0_7 = arith.constant 0 : index
    %c0_8 = arith.constant 0 : index
    %4 = vector.load %arg4[%c0_6, %c0_7, %c0_8] : memref<1x8x16xf32, #tpu.memory_space<vmem>>, vector<1x8x16xf32>
    %5 = vector.shape_cast %4 : vector<1x8x16xf32> to vector<8x16xf32>
    %cst = arith.constant dense<0xFF800000> : vector<10x18xf32>
    %6 = vector.multi_reduction <maximumf>, %1, %cst [0] : vector<4x10x18xf32> to vector<10x18xf32>
    %7 = vector.shape_cast %6 : vector<10x18xf32> to vector<1x10x18xf32>
    %8 = vector.broadcast %7 : vector<1x10x18xf32> to vector<4x10x18xf32>
    %9 = arith.subf %1, %8 : vector<4x10x18xf32>
    %10 = math.exp %9 : vector<4x10x18xf32>
    %cst_9 = arith.constant dense<0.000000e+00> : vector<10x18xf32>
    %11 = vector.multi_reduction <add>, %10, %cst_9 [0] : vector<4x10x18xf32> to vector<10x18xf32>
    %12 = vector.shape_cast %11 : vector<10x18xf32> to vector<1x10x18xf32>
    %13 = math.log %12 : vector<1x10x18xf32>
    %14 = vector.broadcast %13 : vector<1x10x18xf32> to vector<4x10x18xf32>
    %15 = arith.subf %9, %14 : vector<4x10x18xf32>
    %16 = math.exp %15 : vector<4x10x18xf32>
    %17 = vector.extract_strided_slice %15 {offsets = [0, 1, 1], sizes = [4, 8, 16], strides = [1, 1, 1]} : vector<4x10x18xf32> to vector<4x8x16xf32>
    %18 = vector.extract_strided_slice %3 {offsets = [2, 1], sizes = [8, 16], strides = [1, 1]} : vector<10x18xf32> to vector<8x16xf32>
    %c0_i32 = arith.constant 0 : i32
    %19 = vector.broadcast %c0_i32 : i32 to vector<8x16xi32>
    %20 = vector.extract_strided_slice %3 {offsets = [0, 1], sizes = [8, 16], strides = [1, 1]} : vector<10x18xf32> to vector<8x16xf32>
    %21 = arith.cmpf olt, %20, %18 : vector<8x16xf32>
    %c1_i32 = arith.constant 1 : i32
    %22 = vector.broadcast %c1_i32 : i32 to vector<8x16xi32>
    %23 = arith.select %21, %22, %19 : vector<8x16xi1>, vector<8x16xi32>
    %24 = arith.select %21, %20, %18 : vector<8x16xi1>, vector<8x16xf32>
    %25 = vector.extract_strided_slice %3 {offsets = [1, 0], sizes = [8, 16], strides = [1, 1]} : vector<10x18xf32> to vector<8x16xf32>
    %26 = arith.cmpf olt, %25, %24 : vector<8x16xf32>
    %c2_i32 = arith.constant 2 : i32
    %27 = vector.broadcast %c2_i32 : i32 to vector<8x16xi32>
    %28 = arith.select %26, %27, %23 : vector<8x16xi1>, vector<8x16xi32>
    %29 = arith.select %26, %25, %24 : vector<8x16xi1>, vector<8x16xf32>
    %30 = vector.extract_strided_slice %3 {offsets = [1, 2], sizes = [8, 16], strides = [1, 1]} : vector<10x18xf32> to vector<8x16xf32>
    %31 = arith.cmpf olt, %30, %29 : vector<8x16xf32>
    %c3_i32 = arith.constant 3 : i32
    %32 = vector.broadcast %c3_i32 : i32 to vector<8x16xi32>
    %33 = arith.select %31, %32, %28 : vector<8x16xi1>, vector<8x16xi32>
    %34 = arith.select %31, %30, %29 : vector<8x16xi1>, vector<8x16xf32>
    %35 = vector.extract_strided_slice %3 {offsets = [0, 2], sizes = [8, 16], strides = [1, 1]} : vector<10x18xf32> to vector<8x16xf32>
    %36 = arith.cmpf olt, %35, %34 : vector<8x16xf32>
    %c4_i32 = arith.constant 4 : i32
    %37 = vector.broadcast %c4_i32 : i32 to vector<8x16xi32>
    %38 = arith.select %36, %37, %33 : vector<8x16xi1>, vector<8x16xi32>
    %39 = arith.select %36, %35, %34 : vector<8x16xi1>, vector<8x16xf32>
    %40 = vector.extract_strided_slice %3 {offsets = [2, 2], sizes = [8, 16], strides = [1, 1]} : vector<10x18xf32> to vector<8x16xf32>
    %41 = arith.cmpf olt, %40, %39 : vector<8x16xf32>
    %c5_i32 = arith.constant 5 : i32
    %42 = vector.broadcast %c5_i32 : i32 to vector<8x16xi32>
    %43 = arith.select %41, %42, %38 : vector<8x16xi1>, vector<8x16xi32>
    %44 = arith.select %41, %40, %39 : vector<8x16xi1>, vector<8x16xf32>
    %45 = vector.extract_strided_slice %3 {offsets = [0, 0], sizes = [8, 16], strides = [1, 1]} : vector<10x18xf32> to vector<8x16xf32>
    %46 = arith.cmpf olt, %45, %44 : vector<8x16xf32>
    %c6_i32 = arith.constant 6 : i32
    %47 = vector.broadcast %c6_i32 : i32 to vector<8x16xi32>
    %48 = arith.select %46, %47, %43 : vector<8x16xi1>, vector<8x16xi32>
    %49 = arith.select %46, %45, %44 : vector<8x16xi1>, vector<8x16xf32>
    %50 = vector.extract_strided_slice %3 {offsets = [2, 0], sizes = [8, 16], strides = [1, 1]} : vector<10x18xf32> to vector<8x16xf32>
    %51 = arith.cmpf olt, %50, %49 : vector<8x16xf32>
    %c7_i32 = arith.constant 7 : i32
    %52 = vector.broadcast %c7_i32 : i32 to vector<8x16xi32>
    %53 = arith.select %51, %52, %48 : vector<8x16xi1>, vector<8x16xi32>
    %54 = arith.select %51, %50, %49 : vector<8x16xi1>, vector<8x16xf32>
    %55 = vector.extract_strided_slice %3 {offsets = [1, 1], sizes = [8, 16], strides = [1, 1]} : vector<10x18xf32> to vector<8x16xf32>
    %56 = arith.cmpf olt, %55, %54 : vector<8x16xf32>
    %c8_i32 = arith.constant 8 : i32
    %57 = vector.broadcast %c8_i32 : i32 to vector<8x16xi32>
    %58 = arith.select %56, %57, %53 : vector<8x16xi1>, vector<8x16xi32>
    %59 = vector.extract_strided_slice %15 {offsets = [0, 2, 1], sizes = [4, 8, 16], strides = [1, 1, 1]} : vector<4x10x18xf32> to vector<4x8x16xf32>
    %60 = vector.extract_strided_slice %16 {offsets = [0, 2, 1], sizes = [4, 8, 16], strides = [1, 1, 1]} : vector<4x10x18xf32> to vector<4x8x16xf32>
    %61 = arith.subf %59, %17 : vector<4x8x16xf32>
    %62 = arith.mulf %60, %61 : vector<4x8x16xf32>
    %cst_10 = arith.constant dense<0.000000e+00> : vector<8x16xf32>
    %63 = vector.multi_reduction <add>, %62, %cst_10 [0] : vector<4x8x16xf32> to vector<8x16xf32>
    %cst_11 = arith.constant 1.000000e+00 : f32
    %64 = vector.broadcast %cst_11 : f32 to vector<8x16xf32>
    %c0_i32_12 = arith.constant 0 : i32
    %65 = vector.broadcast %c0_i32_12 : i32 to vector<8x16xi32>
    %66 = arith.cmpi eq, %58, %65 : vector<8x16xi32>
    %cst_13 = arith.constant 0.000000e+00 : f32
    %67 = vector.broadcast %cst_13 : f32 to vector<8x16xf32>
    %68 = arith.select %66, %63, %67 : vector<8x16xi1>, vector<8x16xf32>
    %69 = vector.extract_strided_slice %15 {offsets = [0, 0, 1], sizes = [4, 8, 16], strides = [1, 1, 1]} : vector<4x10x18xf32> to vector<4x8x16xf32>
    %70 = vector.extract_strided_slice %16 {offsets = [0, 0, 1], sizes = [4, 8, 16], strides = [1, 1, 1]} : vector<4x10x18xf32> to vector<4x8x16xf32>
    %71 = arith.subf %69, %17 : vector<4x8x16xf32>
    %72 = arith.mulf %70, %71 : vector<4x8x16xf32>
    %cst_14 = arith.constant dense<0.000000e+00> : vector<8x16xf32>
    %73 = vector.multi_reduction <add>, %72, %cst_14 [0] : vector<4x8x16xf32> to vector<8x16xf32>
    %74 = arith.maximumf %63, %73 : vector<8x16xf32>
    %75 = arith.subf %63, %74 : vector<8x16xf32>
    %76 = math.exp %75 : vector<8x16xf32>
    %77 = arith.mulf %64, %76 : vector<8x16xf32>
    %78 = arith.subf %73, %74 : vector<8x16xf32>
    %79 = math.exp %78 : vector<8x16xf32>
    %80 = arith.addf %77, %79 : vector<8x16xf32>
    %c1_i32_15 = arith.constant 1 : i32
    %81 = vector.broadcast %c1_i32_15 : i32 to vector<8x16xi32>
    %82 = arith.cmpi eq, %58, %81 : vector<8x16xi32>
    %cst_16 = arith.constant 0.000000e+00 : f32
    %83 = vector.broadcast %cst_16 : f32 to vector<8x16xf32>
    %84 = arith.select %82, %73, %83 : vector<8x16xi1>, vector<8x16xf32>
    %85 = arith.addf %68, %84 : vector<8x16xf32>
    %86 = vector.extract_strided_slice %15 {offsets = [0, 1, 0], sizes = [4, 8, 16], strides = [1, 1, 1]} : vector<4x10x18xf32> to vector<4x8x16xf32>
    %87 = vector.extract_strided_slice %16 {offsets = [0, 1, 0], sizes = [4, 8, 16], strides = [1, 1, 1]} : vector<4x10x18xf32> to vector<4x8x16xf32>
    %88 = arith.subf %86, %17 : vector<4x8x16xf32>
    %89 = arith.mulf %87, %88 : vector<4x8x16xf32>
    %cst_17 = arith.constant dense<0.000000e+00> : vector<8x16xf32>
    %90 = vector.multi_reduction <add>, %89, %cst_17 [0] : vector<4x8x16xf32> to vector<8x16xf32>
    %91 = arith.maximumf %74, %90 : vector<8x16xf32>
    %92 = arith.subf %74, %91 : vector<8x16xf32>
    %93 = math.exp %92 : vector<8x16xf32>
    %94 = arith.mulf %80, %93 : vector<8x16xf32>
    %95 = arith.subf %90, %91 : vector<8x16xf32>
    %96 = math.exp %95 : vector<8x16xf32>
    %97 = arith.addf %94, %96 : vector<8x16xf32>
    %c2_i32_18 = arith.constant 2 : i32
    %98 = vector.broadcast %c2_i32_18 : i32 to vector<8x16xi32>
    %99 = arith.cmpi eq, %58, %98 : vector<8x16xi32>
    %cst_19 = arith.constant 0.000000e+00 : f32
    %100 = vector.broadcast %cst_19 : f32 to vector<8x16xf32>
    %101 = arith.select %99, %90, %100 : vector<8x16xi1>, vector<8x16xf32>
    %102 = arith.addf %85, %101 : vector<8x16xf32>
    %103 = vector.extract_strided_slice %15 {offsets = [0, 1, 2], sizes = [4, 8, 16], strides = [1, 1, 1]} : vector<4x10x18xf32> to vector<4x8x16xf32>
    %104 = vector.extract_strided_slice %16 {offsets = [0, 1, 2], sizes = [4, 8, 16], strides = [1, 1, 1]} : vector<4x10x18xf32> to vector<4x8x16xf32>
    %105 = arith.subf %103, %17 : vector<4x8x16xf32>
    %106 = arith.mulf %104, %105 : vector<4x8x16xf32>
    %cst_20 = arith.constant dense<0.000000e+00> : vector<8x16xf32>
    %107 = vector.multi_reduction <add>, %106, %cst_20 [0] : vector<4x8x16xf32> to vector<8x16xf32>
    %108 = arith.maximumf %91, %107 : vector<8x16xf32>
    %109 = arith.subf %91, %108 : vector<8x16xf32>
    %110 = math.exp %109 : vector<8x16xf32>
    %111 = arith.mulf %97, %110 : vector<8x16xf32>
    %112 = arith.subf %107, %108 : vector<8x16xf32>
    %113 = math.exp %112 : vector<8x16xf32>
    %114 = arith.addf %111, %113 : vector<8x16xf32>
    %c3_i32_21 = arith.constant 3 : i32
    %115 = vector.broadcast %c3_i32_21 : i32 to vector<8x16xi32>
    %116 = arith.cmpi eq, %58, %115 : vector<8x16xi32>
    %cst_22 = arith.constant 0.000000e+00 : f32
    %117 = vector.broadcast %cst_22 : f32 to vector<8x16xf32>
    %118 = arith.select %116, %107, %117 : vector<8x16xi1>, vector<8x16xf32>
    %119 = arith.addf %102, %118 : vector<8x16xf32>
    %120 = vector.extract_strided_slice %15 {offsets = [0, 0, 2], sizes = [4, 8, 16], strides = [1, 1, 1]} : vector<4x10x18xf32> to vector<4x8x16xf32>
    %121 = vector.extract_strided_slice %16 {offsets = [0, 0, 2], sizes = [4, 8, 16], strides = [1, 1, 1]} : vector<4x10x18xf32> to vector<4x8x16xf32>
    %122 = arith.subf %120, %17 : vector<4x8x16xf32>
    %123 = arith.mulf %121, %122 : vector<4x8x16xf32>
    %cst_23 = arith.constant dense<0.000000e+00> : vector<8x16xf32>
    %124 = vector.multi_reduction <add>, %123, %cst_23 [0] : vector<4x8x16xf32> to vector<8x16xf32>
    %125 = arith.maximumf %108, %124 : vector<8x16xf32>
    %126 = arith.subf %108, %125 : vector<8x16xf32>
    %127 = math.exp %126 : vector<8x16xf32>
    %128 = arith.mulf %114, %127 : vector<8x16xf32>
    %129 = arith.subf %124, %125 : vector<8x16xf32>
    %130 = math.exp %129 : vector<8x16xf32>
    %131 = arith.addf %128, %130 : vector<8x16xf32>
    %c4_i32_24 = arith.constant 4 : i32
    %132 = vector.broadcast %c4_i32_24 : i32 to vector<8x16xi32>
    %133 = arith.cmpi eq, %58, %132 : vector<8x16xi32>
    %cst_25 = arith.constant 0.000000e+00 : f32
    %134 = vector.broadcast %cst_25 : f32 to vector<8x16xf32>
    %135 = arith.select %133, %124, %134 : vector<8x16xi1>, vector<8x16xf32>
    %136 = arith.addf %119, %135 : vector<8x16xf32>
    %137 = vector.extract_strided_slice %15 {offsets = [0, 2, 2], sizes = [4, 8, 16], strides = [1, 1, 1]} : vector<4x10x18xf32> to vector<4x8x16xf32>
    %138 = vector.extract_strided_slice %16 {offsets = [0, 2, 2], sizes = [4, 8, 16], strides = [1, 1, 1]} : vector<4x10x18xf32> to vector<4x8x16xf32>
    %139 = arith.subf %137, %17 : vector<4x8x16xf32>
    %140 = arith.mulf %138, %139 : vector<4x8x16xf32>
    %cst_26 = arith.constant dense<0.000000e+00> : vector<8x16xf32>
    %141 = vector.multi_reduction <add>, %140, %cst_26 [0] : vector<4x8x16xf32> to vector<8x16xf32>
    %142 = arith.maximumf %125, %141 : vector<8x16xf32>
    %143 = arith.subf %125, %142 : vector<8x16xf32>
    %144 = math.exp %143 : vector<8x16xf32>
    %145 = arith.mulf %131, %144 : vector<8x16xf32>
    %146 = arith.subf %141, %142 : vector<8x16xf32>
    %147 = math.exp %146 : vector<8x16xf32>
    %148 = arith.addf %145, %147 : vector<8x16xf32>
    %c5_i32_27 = arith.constant 5 : i32
    %149 = vector.broadcast %c5_i32_27 : i32 to vector<8x16xi32>
    %150 = arith.cmpi eq, %58, %149 : vector<8x16xi32>
    %cst_28 = arith.constant 0.000000e+00 : f32
    %151 = vector.broadcast %cst_28 : f32 to vector<8x16xf32>
    %152 = arith.select %150, %141, %151 : vector<8x16xi1>, vector<8x16xf32>
    %153 = arith.addf %136, %152 : vector<8x16xf32>
    %154 = vector.extract_strided_slice %15 {offsets = [0, 0, 0], sizes = [4, 8, 16], strides = [1, 1, 1]} : vector<4x10x18xf32> to vector<4x8x16xf32>
    %155 = vector.extract_strided_slice %16 {offsets = [0, 0, 0], sizes = [4, 8, 16], strides = [1, 1, 1]} : vector<4x10x18xf32> to vector<4x8x16xf32>
    %156 = arith.subf %154, %17 : vector<4x8x16xf32>
    %157 = arith.mulf %155, %156 : vector<4x8x16xf32>
    %cst_29 = arith.constant dense<0.000000e+00> : vector<8x16xf32>
    %158 = vector.multi_reduction <add>, %157, %cst_29 [0] : vector<4x8x16xf32> to vector<8x16xf32>
    %159 = arith.maximumf %142, %158 : vector<8x16xf32>
    %160 = arith.subf %142, %159 : vector<8x16xf32>
    %161 = math.exp %160 : vector<8x16xf32>
    %162 = arith.mulf %148, %161 : vector<8x16xf32>
    %163 = arith.subf %158, %159 : vector<8x16xf32>
    %164 = math.exp %163 : vector<8x16xf32>
    %165 = arith.addf %162, %164 : vector<8x16xf32>
    %c6_i32_30 = arith.constant 6 : i32
    %166 = vector.broadcast %c6_i32_30 : i32 to vector<8x16xi32>
    %167 = arith.cmpi eq, %58, %166 : vector<8x16xi32>
    %cst_31 = arith.constant 0.000000e+00 : f32
    %168 = vector.broadcast %cst_31 : f32 to vector<8x16xf32>
    %169 = arith.select %167, %158, %168 : vector<8x16xi1>, vector<8x16xf32>
    %170 = arith.addf %153, %169 : vector<8x16xf32>
    %171 = vector.extract_strided_slice %15 {offsets = [0, 2, 0], sizes = [4, 8, 16], strides = [1, 1, 1]} : vector<4x10x18xf32> to vector<4x8x16xf32>
    %172 = vector.extract_strided_slice %16 {offsets = [0, 2, 0], sizes = [4, 8, 16], strides = [1, 1, 1]} : vector<4x10x18xf32> to vector<4x8x16xf32>
    %173 = arith.subf %171, %17 : vector<4x8x16xf32>
    %174 = arith.mulf %172, %173 : vector<4x8x16xf32>
    %cst_32 = arith.constant dense<0.000000e+00> : vector<8x16xf32>
    %175 = vector.multi_reduction <add>, %174, %cst_32 [0] : vector<4x8x16xf32> to vector<8x16xf32>
    %176 = arith.maximumf %159, %175 : vector<8x16xf32>
    %177 = arith.subf %159, %176 : vector<8x16xf32>
    %178 = math.exp %177 : vector<8x16xf32>
    %179 = arith.mulf %165, %178 : vector<8x16xf32>
    %180 = arith.subf %175, %176 : vector<8x16xf32>
    %181 = math.exp %180 : vector<8x16xf32>
    %182 = arith.addf %179, %181 : vector<8x16xf32>
    %c7_i32_33 = arith.constant 7 : i32
    %183 = vector.broadcast %c7_i32_33 : i32 to vector<8x16xi32>
    %184 = arith.cmpi eq, %58, %183 : vector<8x16xi32>
    %cst_34 = arith.constant 0.000000e+00 : f32
    %185 = vector.broadcast %cst_34 : f32 to vector<8x16xf32>
    %186 = arith.select %184, %175, %185 : vector<8x16xi1>, vector<8x16xf32>
    %187 = arith.addf %170, %186 : vector<8x16xf32>
    %188 = math.log %182 : vector<8x16xf32>
    %189 = arith.addf %176, %188 : vector<8x16xf32>
    %190 = arith.subf %189, %187 : vector<8x16xf32>
    %191 = vector.extract_strided_slice %3 {offsets = [1, 1], sizes = [8, 16], strides = [1, 1]} : vector<10x18xf32> to vector<8x16xf32>
    %cst_35 = arith.constant 2.000000e+01 : f32
    %192 = vector.broadcast %cst_35 : f32 to vector<8x16xf32>
    %193 = arith.minimumf %191, %192 : vector<8x16xf32>
    %cst_36 = arith.constant 5.000000e-02 : f32
    %194 = vector.broadcast %cst_36 : f32 to vector<8x16xf32>
    %195 = arith.mulf %193, %194 : vector<8x16xf32>
    %c8_i32_37 = arith.constant 8 : i32
    %196 = vector.broadcast %c8_i32_37 : i32 to vector<8x16xi32>
    %197 = arith.cmpi ne, %58, %196 : vector<8x16xi32>
    %198 = arith.extui %197 : vector<8x16xi1> to vector<8x16xi32>
    %199 = arith.sitofp %198 : vector<8x16xi32> to vector<8x16xf32>
    %200 = arith.mulf %5, %199 : vector<8x16xf32>
    %201 = arith.mulf %190, %195 : vector<8x16xf32>
    %202 = arith.mulf %201, %200 : vector<8x16xf32>
    %c0_38 = arith.constant 0 : index
    %c0_39 = arith.constant 0 : index
    %c0_40 = arith.constant 0 : index
    %203 = vector.load %arg5[%c0_38, %c0_39, %c0_40] : memref<1x8x16xf32, #tpu.memory_space<vmem>>, vector<1x8x16xf32>
    %204 = vector.shape_cast %203 : vector<1x8x16xf32> to vector<8x16xf32>
    %205 = vector.shape_cast %202 : vector<8x16xf32> to vector<1x8x16xf32>
    tpu.vector_store %arg5[%c0_38, %c0_39, %c0_40], %205 {strides = array<i32>} : memref<1x8x16xf32, #tpu.memory_space<vmem>>, vector<1x8x16xf32>,
    %c0_41 = arith.constant 0 : index
    %c0_42 = arith.constant 0 : index
    %c0_43 = arith.constant 0 : index
    %206 = vector.load %arg6[%c0_41, %c0_42, %c0_43] : memref<1x8x16xf32, #tpu.memory_space<vmem>>, vector<1x8x16xf32>
    %207 = vector.shape_cast %206 : vector<1x8x16xf32> to vector<8x16xf32>
    %208 = vector.shape_cast %200 : vector<8x16xf32> to vector<1x8x16xf32>
    tpu.vector_store %arg6[%c0_41, %c0_42, %c0_43], %208 {strides = array<i32>} : memref<1x8x16xf32, #tpu.memory_space<vmem>>, vector<1x8x16xf32>,
    return
  }
  func.func @transform_0(%arg0: i32, %arg1: i32) -> (i32, i32, i32, i32) {
    %c2_i32 = arith.constant 2 : i32
    %0 = arith.muli %arg0, %c2_i32 : i32
    %1 = arith.addi %0, %arg1 : i32
    %c0_i32 = arith.constant 0 : i32
    %c0_i32_0 = arith.constant 0 : i32
    %c0_i32_1 = arith.constant 0 : i32
    %c0_i32_2 = arith.constant 0 : i32
    return %1, %c0_i32, %c0_i32_0, %c0_i32_1 : i32, i32, i32, i32
  }
  func.func @transform_1(%arg0: i32, %arg1: i32) -> (i32, i32, i32) {
    %c2_i32 = arith.constant 2 : i32
    %0 = arith.muli %arg0, %c2_i32 : i32
    %1 = arith.addi %0, %arg1 : i32
    %c0_i32 = arith.constant 0 : i32
    %c0_i32_0 = arith.constant 0 : i32
    %c0_i32_1 = arith.constant 0 : i32
    return %1, %c0_i32, %c0_i32_0 : i32, i32, i32
  }
  func.func @transform_2(%arg0: i32, %arg1: i32) -> (i32, i32, i32) {
    %c0_i32 = arith.constant 0 : i32
    %c0_i32_0 = arith.constant 0 : i32
    return %arg0, %arg1, %c0_i32 : i32, i32, i32
  }
  func.func @transform_3(%arg0: i32, %arg1: i32) -> (i32, i32, i32) {
    %c0_i32 = arith.constant 0 : i32
    %c0_i32_0 = arith.constant 0 : i32
    return %arg0, %arg1, %c0_i32 : i32, i32, i32
  }
  func.func @transform_4(%arg0: i32, %arg1: i32) -> (i32, i32, i32) {
    %c0_i32 = arith.constant 0 : i32
    %c0_i32_0 = arith.constant 0 : i32
    return %arg0, %arg1, %c0_i32 : i32, i32, i32
  }
}

</mosaic_0001>

<bundles_post_ra>
// kernel: _abl_forward.5
= control target key start
LH: loop header
LB: loop body
LE: loop exit
PB: predicated region body
PF: predicated region fallthrough
CT: control target
= control target key end

     0   :  { %s593_s6 = smov 0   ;;  %s595_s7 = smov 0   ;;  %s760_s0 = inlined_call_operand.vmem [shape: f32[4,4,10,18], index: 0, kind: input, shape index: {}]   ;;  %s761_s1 = inlined_call_operand.vmem [shape: f32[2,16,16], index: 1, kind: output, shape index: {}]  }
   0x1   :  { %s597_s8 = smov 0   ;;  %s599_s9 = smov 0  }
   0x2   :  { %s601_s10 = smov 0  }
   0x3 LB: > { %s20_s11 = sadd.s32 1, %s572_s8  ;;  %s23_s12 = sadd.s32 1, %s576_s9  ;;  %s580_s10 = sphi %s601_s10, %s11_s10   ;;  %s576_s9 = sphi %s599_s9, %s765_s9   ;;  %s572_s8 = sphi %s597_s8, %s764_s8   ;;  %s568_s7 = sphi %s595_s7, %s763_s7   ;;  %s564_s6 = sphi %s593_s6, %s762_s6  }
   0x4   : > { %p21_p0 = scmp.ge.s32.totalorder %s20_s11, 2  ;;  %p456_p1 = scmp.ge.s32.totalorder %s580_s10, 1 }
   0x5   : > { %p109_p2 = scmp.lt.s32.totalorder %s580_s10, 5 }
   0x6   : > { %s767_s11 = smov (%p21_p0, %s20_s11), 0  ;;  %s769_s12 = smov (!%p21_p0, %s23_s12), %s576_s9 }
   0x7   : > { %p110_p3 = pnand %p456_p1, %p109_p2  ;;  %p25_p4 = scmp.ge.s32.totalorder %s769_s12, 2 }
   0x8   : > { %s457_s13 = sshll.u32 (!%p110_p3), %s568_s7, 1  ;;  %vm159_vm0 = vcmask (!%p110_p3), 146432   ;;  %vm167_vm1 = vcmask (!%p110_p3), 140288   ;;  %s582_s19 = smov (!%p110_p3), 127   ;;  %vm249_vm2 = vcmask (!%p110_p3), 1046528   ;;  %vm286_vm3 = vcmask (!%p110_p3), 138249  }
   0x9   : > { %s771_s12 = smov (%p25_p4, %s769_s12), 0  ;;  %113 = sbr.rel (%p110_p3) target bundleno = 317 (0x13d), region = 24 }
   0xa   : > { %s135_s14 = sadd.s32 (!%p110_p3), %s564_s6, %s457_s13  ;;  %vm294_vm4 = vcmask (!%p110_p3), 131080   ;;  %p143_p6 = scmp.lt.s32.totalorder (!%p110_p3), %s568_s7, 1  ;;  %vm368_vm5 = vcmask (!%p110_p3), 122880   ;;  %vm366_vm6 = vcmask (!%p110_p3), 130049  }
   0xb   : > { %p136_p5 = scmp.lt.s32.totalorder (!%p110_p3), %s135_s14, 3  ;;  %p145_p7 = scmp.lt.s32.totalorder (!%p110_p3), %s564_s6, 1 }
  0x10   : > { %s773_s14 = smov (!%p136_p5, %s135_s14), 3  ;;  %s775_s7 = smov (!%p143_p6, %s568_s7), 1 }
  0x11   : > { %s464_s15 = sshll.u32 %s773_s14, 6  ;;  %s777_s6 = smov (!%p145_p7, %s564_s6), 1 }
  0x12   : > { %s140_s18 = scalar_lea.vmem %s760_s0, %s464_s15  ;;  %s460_s20 = sshll.u32 %s775_s7, 1 }
  0x13   : > { %v151_v0 = vld [vmem:[%s140_s18] sm:$0xff]  ;;  %v153_v1 = vld [vmem:[%s140_s18 + $0x10] sm:$0xff]  ;;  %v152_v7 = vld [vmem:[%s140_s18 + $0x8] sm:$0x3]  ;;  %s148_s21 = sadd.s32 %s460_s20, %s777_s6 }
  0x14   : > { %v155_v2 = vld [vmem:[%s140_s18 + $0x20] sm:$0xff]  ;;  %v157_v3 = vld [vmem:[%s140_s18 + $0x30] sm:$0xff]  ;;  %v160_v4 = vsel %vm159_vm0, %v151_v0, -inf  ;;  %v161_v5 = vsel %vm159_vm0, %v153_v1, -inf  ;;  %v154_v10 = vld [vmem:[%s140_s18 + $0x18] sm:$0x3] }
  0x15   : > { %v162_v6 = vsel %vm159_vm0, %v155_v2, -inf  ;;  %v164_v9 = vsel %vm159_vm0, %v157_v3, -inf  ;;  %v156_v11 = vld [vmem:[%s140_s18 + $0x28] sm:$0x3]  ;;  %v168_v12 = vsel %vm167_vm1, %v152_v7, -inf  ;;  %v169_v15 = vsel %vm167_vm1, %v154_v10, -inf }
  0x16   : > { %v163_v8 = vmax.f32 %v160_v4, %v162_v6  ;;  %v165_v13 = vmax.f32 %v161_v5, %v164_v9  ;;  %v158_v14 = vld [vmem:[%s140_s18 + $0x38] sm:$0x3]  ;;  %v170_v16 = vsel %vm167_vm1, %v156_v11, -inf  ;;  %s461_s22 = sshll.u32 %s148_s21, 3 }
  0x17   : > { %v171_v17 = vmax.f32 %v168_v12, %v170_v16  ;;  %v172_v18 = vsel %vm167_vm1, %v158_v14, -inf  ;;  %s150_s25 = scalar_lea.vmem %s761_s1, %s461_s22 }
  0x18   : > { %v166_v19 = vmax.f32 %v163_v8, %v165_v13  ;;  %v173_v20 = vmax.f32 %v169_v15, %v172_v18 }
  0x1a   : > { %v175_v21 = vsub.f32 %v151_v0, %v166_v19  ;;  %v177_v22 = vsub.f32 %v153_v1, %v166_v19  ;;  %v179_v23 = vsub.f32 %v155_v2, %v166_v19  ;;  %v640_v24 = vsub.f32 %v157_v3, %v166_v19 }
  0x1b   : > { %v174_v25 = vmax.f32 %v171_v17, %v173_v20 }
  0x1c   : > { %v183_v26 = vmul.f32 1.442695, %v175_v21  ;;  %v187_v27 = vmul.f32 1.442695, %v177_v22  ;;  %v191_v28 = vmul.f32 1.442695, %v179_v23 }
  0x1d   : > { %v195_v29 = vmul.f32 1.442695, %v640_v24  ;;  %v176_v30 = vsub.f32 %v152_v7, %v174_v25  ;;  %v178_v31 = vsub.f32 %v154_v10, %v174_v25  ;;  %v180_v32 = vsub.f32 %v156_v11, %v174_v25 }
  0x1e   : > { %506 = vpow2.f32 %v183_v26  ;;  %v182_v33 = vsub.f32 %v158_v14, %v174_v25 }
  0x1f   : > { %508 = vpow2.f32 %v187_v27  ;;  %v185_v34 = vmul.f32 1.442695, %v176_v30  ;;  %v189_v35 = vmul.f32 1.442695, %v178_v31  ;;  %v193_v36 = vmul.f32 1.442695, %v180_v32 }
  0x20   : > { %510 = vpow2.f32 %v191_v28  ;;  %v197_v37 = vmul.f32 1.442695, %v182_v33 }
  0x21   : > { %512 = vpow2.f32 %v195_v29 }
  0x22   : > { %514 = vpow2.f32 %v185_v34 }
  0x23   : > { %516 = vpow2.f32 %v189_v35 }
  0x24   : > { %518 = vpow2.f32 %v193_v36 }
  0x25   : > { %520 = vpow2.f32 %v197_v37 }
  0x28   : > { %v507_v38 = vpop.eup %506 }
  0x29   : > { %v509_v39 = vpop.eup %508  ;;  %v199_v40 = vsel %vm159_vm0, %v507_v38, 0.0 }
  0x2a   : > { %v511_v41 = vpop.eup %510  ;;  %v200_v42 = vsel %vm159_vm0, %v509_v39, 0.0 }
  0x2b   : > { %v513_v43 = vpop.eup %512  ;;  %v201_v44 = vadd.f32 %v200_v42, %v199_v40  ;;  %v202_v45 = vsel %vm159_vm0, %v511_v41, 0.0 }
  0x2c   : > { %v515_v46 = vpop.eup %514  ;;  %v204_v47 = vsel %vm159_vm0, %v513_v43, 0.0 }
  0x2d   : > { %v517_v48 = vpop.eup %516  ;;  %v203_v49 = vadd.f32 %v202_v45, %v201_v44  ;;  %v206_v50 = vsel %vm167_vm1, %v515_v46, 0.0 }
  0x2e   : > { %v519_v51 = vpop.eup %518  ;;  %v207_v52 = vsel %vm167_vm1, %v517_v48, 0.0 }
  0x2f   : > { %v521_v53 = vpop.eup %520  ;;  %v205_v54 = vadd.f32 %v204_v47, %v203_v49  ;;  %v208_v55 = vadd.f32 %v207_v52, %v206_v50  ;;  %v209_v56 = vsel %vm167_vm1, %v519_v51, 0.0 }
  0x30   : > { %v211_v57 = vsel %vm167_vm1, %v521_v53, 0.0 }
  0x31   : > { %522 = vlog2.f32 %v205_v54  ;;  %v210_v58 = vadd.f32 %v209_v56, %v208_v55 }
  0x33   : > { %v212_v59 = vadd.f32 %v211_v57, %v210_v58 }
  0x35   : > { %524 = vlog2.f32 %v212_v59 }
  0x3b   : > { %v523_v60 = vpop.eup %522 }
  0x3c   : > { %v214_v61 = vmul.f32 0.6931472, %v523_v60 }
  0x3e   : > { %v651_v62 = vsub.f32 %v177_v22, %v214_v61  ;;  %v653_v63 = vsub.f32 %v175_v21, %v214_v61  ;;  %v669_v5 = vsub.f32 %v179_v23, %v214_v61  ;;  %v678_v7 = vsub.f32 %v640_v24, %v214_v61 }
  0x3f   : > { %v525_v0 = vpop.eup %524 }
  0x40   : > { %306 = vrot.lane.b32.xlu1 %v651_v62, %s582_s19  ;;  %302 = vrot.lane.b32.xlu0 %v653_v63, %s582_s19  ;;  %v216_v1 = vmul.f32 0.6931472, %v525_v0  ;;  %v229_v8 = vmul.f32 1.442695, %v651_v62  ;;  %v225_v9 = vmul.f32 1.442695, %v653_v63 }
  0x41   : > { %v233_v12 = vmul.f32 1.442695, %v669_v5  ;;  %v250_v13 = vrot.slane %v653_v63, 1  ;;  %v253_v14 = vrot.slane %v651_v62, 1  ;;  %v237_v19 = vmul.f32 1.442695, %v678_v7 }
  0x42   : > { %v659_v2 = vsub.f32 %v178_v31, %v216_v1  ;;  %v661_v3 = vsub.f32 %v176_v30, %v216_v1  ;;  %v667_v4 = vsub.f32 %v180_v32, %v216_v1  ;;  %v675_v6 = vsub.f32 %v182_v33, %v216_v1 }
  0x43   : > { %526 = vpow2.f32 %v229_v8  ;;  %v256_v20 = vrot.slane %v669_v5, 1  ;;  %v259_v25 = vrot.slane %v678_v7, 1 }
  0x44   : > { %308 = vrot.lane.b32.xlu1 %v659_v2, %s582_s19  ;;  %304 = vrot.lane.b32.xlu0 %v661_v3, %s582_s19  ;;  %v231_v10 = vmul.f32 1.442695, %v659_v2  ;;  %v227_v11 = vmul.f32 1.442695, %v661_v3  ;;  %528 = vpow2.f32 %v225_v9  ;;  %v235_v15 = vmul.f32 1.442695, %v667_v4 }
  0x45   : > { %v251_v16 = vrot.slane %v661_v3, 1  ;;  %v254_v17 = vrot.slane %v659_v2, 1  ;;  %v239_v18 = vmul.f32 1.442695, %v675_v6  ;;  %v257_v21 = vrot.slane %v667_v4, 1 }
  0x46   : > { %530 = vpow2.f32 %v231_v10  ;;  %v260_v24 = vrot.slane %v675_v6, 1 }
  0x47   : > { %532 = vpow2.f32 %v227_v11  ;;  %v252_v22 = vsel %vm249_vm2, %v250_v13, %v251_v16  ;;  %v255_v23 = vsel %vm249_vm2, %v253_v14, %v254_v17  ;;  %v271_v29 = vsub.f32 %v661_v3, %v251_v16 }
  0x48   : > { %312 = vrot.lane.b32.xlu1 %v667_v4, %s582_s19  ;;  %310 = vrot.lane.b32.xlu0 %v669_v5, %s582_s19  ;;  %534 = vpow2.f32 %v233_v12  ;;  %v270_v26 = vsub.f32 %v653_v63, %v252_v22  ;;  %v272_v27 = vsub.f32 %v651_v62, %v255_v23  ;;  %v273_v30 = vsub.f32 %v659_v2, %v254_v17 }
  0x49   : > { %536 = vpow2.f32 %v235_v15  ;;  %v258_v31 = vsel %vm249_vm2, %v256_v20, %v257_v21  ;;  %v275_v34 = vsub.f32 %v667_v4, %v257_v21  ;;  %v261_v38 = vsel %vm249_vm2, %v259_v25, %v260_v24 }
  0x4a   : > { %538 = vpow2.f32 %v239_v18  ;;  %v274_v39 = vsub.f32 %v669_v5, %v258_v31  ;;  %v277_v48 = vsub.f32 %v675_v6, %v260_v24  ;;  %v276_v49 = vsub.f32 %v678_v7, %v261_v38 }
  0x4b   : > { %540 = vpow2.f32 %v237_v19 }
  0x4c   : > { %316 = vrot.lane.b32.xlu1 %v675_v6, %s582_s19  ;;  %314 = vrot.lane.b32.xlu0 %v678_v7, %s582_s19 }
  0x4d   : > { %v527_v28 = vpop.eup %526 }
  0x4e   : > { %v529_v32 = vpop.eup %528  ;;  %v280_v41 = vmul.f32 %v527_v28, %v272_v27 }
  0x4f   : > { %v278_v40 = vmul.f32 %v529_v32, %v270_v26 }
  0x50   : > { %v531_v33 = vpop.eup %530  ;;  %v288_v56 = vsel %vm286_vm3, %v280_v41, 0.0 }
  0x51   : > { %v533_v35 = vpop.eup %532  ;;  %v281_v43 = vmul.f32 %v531_v33, %v273_v30  ;;  %v287_v55 = vsel %vm286_vm3, %v278_v40, 0.0 }
  0x52   : > { %v279_v42 = vmul.f32 %v533_v35, %v271_v29  ;;  %v535_v44 = vpop.eup %534  ;;  %v289_v13 = vadd.f32 %v288_v56, %v287_v55 }
  0x53   : > { %v537_v47 = vpop.eup %536  ;;  %v282_v54 = vmul.f32 %v535_v44, %v274_v39  ;;  %v296_v61 = vsel %vm294_vm4, %v281_v43, 0.0 }
  0x54   : > { %v539_v50 = vpop.eup %538  ;;  %v283_v53 = vmul.f32 %v537_v47, %v275_v34  ;;  %v295_v60 = vsel %vm294_vm4, %v279_v42, 0.0 }
  0x55   : > { %v541_v57 = vpop.eup %540  ;;  %v285_v10 = vmul.f32 %v539_v50, %v277_v48  ;;  %v297_v11 = vadd.f32 %v296_v61, %v295_v60  ;;  %v290_v15 = vsel %vm286_vm3, %v282_v54, 0.0 }
  0x56   : > { %v284_v12 = vmul.f32 %v541_v57, %v276_v49 }
  0x58   : > { %v292_v25 = vsel %vm286_vm3, %v284_v12, 0.0 }
  0xb2   : > { %v307_v36 = vpop.permute.xlu1 %306  ;;  %v303_v37 = vpop.permute.xlu0 %302 }
  0xb3   : > { %v328_v45 = vsub.f32 %v651_v62, %v307_v36  ;;  %v326_v46 = vsub.f32 %v653_v63, %v303_v37 }
  0xb5   : > { %v336_v62 = vmul.f32 %v527_v28, %v328_v45  ;;  %v334_v63 = vmul.f32 %v529_v32, %v326_v46 }
  0xb6   : > { %v309_v51 = vpop.permute.xlu1 %308  ;;  %v305_v52 = vpop.permute.xlu0 %304 }
  0xb7   : > { %v329_v58 = vsub.f32 %v659_v2, %v309_v51  ;;  %v327_v59 = vsub.f32 %v661_v3, %v305_v52  ;;  %v298_v3 = vsel %vm294_vm4, %v283_v53, 0.0  ;;  %v343_v16 = vsel %vm286_vm3, %v336_v62, 0.0 }
  0xb8   : > { %v342_v17 = vsel %vm286_vm3, %v334_v63, 0.0  ;;  %v299_v24 = vadd.f32 %v298_v3, %v297_v11 }
  0xb9   : > { %v337_v0 = vmul.f32 %v531_v33, %v329_v58  ;;  %v335_v1 = vmul.f32 %v533_v35, %v327_v59  ;;  %v344_v30 = vadd.f32 %v343_v16, %v342_v17 }
  0xba   : > { %v313_v8 = vpop.permute.xlu1 %312  ;;  %v311_v9 = vpop.permute.xlu0 %310 }
  0xbb   : > { %v331_v14 = vsub.f32 %v667_v4, %v313_v8  ;;  %v330_v2 = vsub.f32 %v669_v5, %v311_v9  ;;  %v350_v18 = vsel %vm294_vm4, %v337_v0, 0.0  ;;  %v349_v19 = vsel %vm294_vm4, %v335_v1, 0.0 }
  0xbc   : > { %v300_v4 = vsel %vm294_vm4, %v285_v10, 0.0  ;;  %v291_v5 = vadd.f32 %v290_v15, %v289_v13  ;;  %v351_v31 = vadd.f32 %v350_v18, %v349_v19 }
  0xbd   : > { %v339_v20 = vmul.f32 %v537_v47, %v331_v14  ;;  %v338_v21 = vmul.f32 %v535_v44, %v330_v2  ;;  %v301_v36 = vadd.f32 %v300_v4, %v299_v24 }
  0xbe   : > { %v317_v22 = vpop.permute.xlu1 %316  ;;  %v315_v23 = vpop.permute.xlu0 %314  ;;  %v293_v37 = vadd.f32 %v292_v25, %v291_v5 }
  0xbf   : > { %v352_v26 = vsel %vm294_vm4, %v339_v20, 0.0  ;;  %v345_v27 = vsel %vm286_vm3, %v338_v21, 0.0  ;;  %v333_v28 = vsub.f32 %v675_v6, %v317_v22  ;;  %v332_v29 = vsub.f32 %v678_v7, %v315_v23 }
  0xc0   : > { %v353_v34 = vadd.f32 %v352_v26, %v351_v31  ;;  %v346_v35 = vadd.f32 %v345_v27, %v344_v30 }
  0xc1   : > { %v341_v32 = vmul.f32 %v539_v50, %v333_v28  ;;  %v340_v33 = vmul.f32 %v541_v57, %v332_v29 }
  0xc3   : > { %v354_v38 = vsel %vm294_vm4, %v341_v32, 0.0  ;;  %v347_v39 = vsel %vm286_vm3, %v340_v33, 0.0 }
  0xc4   : > { %v355_v40 = vadd.f32 %v354_v38, %v353_v34  ;;  %v348_v6 = vadd.f32 %v347_v39, %v346_v35 }
  0xc6   : > { %v357_v41 = vadd.f32 %v355_v40, %v301_v36  ;;  %v356_v7 = vadd.f32 %v348_v6, %v293_v37 }
  0xc8   : > { %362 = vrot.lane.b32.xlu1 %v357_v41, %s582_s19  ;;  %360 = vrot.lane.b32.xlu0 %v356_v7, %s582_s19 }
 0x13a   : > { %v363_v42 = vpop.permute.xlu1 %362  ;;  %v361_v43 = vpop.permute.xlu0 %360 }
 0x13b   : > { %369 = vst.msk [vmem:[%s150_s25 + $0x7] sm:$0x1] %vm368_vm5, %v363_v42 }
 0x13c   : > { %367 = vst.msk [vmem:[%s150_s25 - $0x1] sm:$0xfe] %vm366_vm6, %v361_v43 }
 0x13d PF: > { %s11_s10 = sadd.s32 1, %s580_s10   ;;  %s762_s6 = smov %s572_s8 }
 0x13e   : > { %p8_p8 = scmp.ge.s32.totalorder %s11_s10, 6   ;;  %s763_s7 = smov %s576_s9 }
 0x13f   : > { %s764_s8 = smov %s767_s11  ;;  %s765_s9 = smov %s771_s12 }
 0x140   :  { %10 = sbr.rel (!%p8_p8) target bundleno = 3 (0x3), region = 54 }

// kernel: _abl_forward.4
= control target key start
LH: loop header
LB: loop body
LE: loop exit
PB: predicated region body
PF: predicated region fallthrough
CT: control target
= control target key end

     0   :  { %s459_s6 = smov 0   ;;  %s484_s0 = inlined_call_operand.vmem [shape: f32[2,16,16], index: 0, kind: input, shape index: {}]   ;;  %s485_s1 = inlined_call_operand.vmem [shape: f32[2,16,16], index: 1, kind: output, shape index: {}]  }
   0x1 LB: > { %s347_s7 = sadd.s32 4294967295, %s426_s6   ;;  %p351_p0 = scmp.ge.s32.totalorder %s426_s6, 1  ;;  %s426_s6 = sphi %s459_s6, %s11_s6  }
   0x2   : > { %p87_p1 = scmp.lt.s32.totalorder %s426_s6, 3 }
   0x4   : > { %p88_p2 = pnand %p351_p0, %p87_p1 }
   0x5   : > { %p107_p3 = scmp.lt.s32.totalorder (!%p88_p2), %s347_s7, 1  ;;  %v440_v2 = vmov (!%p88_p2), 1000000.0   ;;  %s441_s15 = smov (!%p88_p2), 127   ;;  %vm140_vm2 = vcmask (!%p88_p2), 121856   ;;  %vm131_vm3 = vcmask (!%p88_p2), 7168   ;;  %v231_v45 = vlaneseq (!%p88_p2) }
   0x6   : > { %91 = sbr.rel (%p88_p2) target bundleno = 558 (0x22e), region = 24  ;;  %s442_s16 = smov (!%p88_p2), 1   ;;  %vm157_vm4 = vcmask (!%p88_p2), 15360   ;;  %vm166_vm5 = vcmask (!%p88_p2), 113664   ;;  %vm183_vm6 = vcmask (!%p88_p2), 31744   ;;  %vm192_vm7 = vcmask (!%p88_p2), 97280  }
   0x7   : > { %s443_s17 = smov (!%p88_p2), 2   ;;  %s444_s18 = smov (!%p88_p2), 126   ;;  %v232_v47 = vshrl.u32 (!%p88_p2), %v231_v45, 7  ;;  %vm209_vm8 = vcmask (!%p88_p2), 64512   ;;  %vm228_vm9 = vcmask (!%p88_p2), 130048  }
   0x8   : > { %s445_s19 = smov (!%p88_p2), 4   ;;  %s446_s20 = smov (!%p88_p2), 124  }
   0x9   : > { %s447_s21 = smov (!%p88_p2), 8   ;;  %v233_v49 = vadd.s32 (!%p88_p2), 8, %v232_v47  ;;  %s448_s22 = smov (!%p88_p2), 120   ;;  %v234_v50 = vcvt.s32.f32 (!%p88_p2), %v232_v47 }
   0xa   : > { %s436_s23 = smov (!%p88_p2), 0  }
   0xb   : > { %v235_v51 = vcvt.s32.f32 (!%p88_p2), %v233_v49 }
   0xd   : > { %s487_s7 = smov (!%p107_p3, %s347_s7), 1 }
   0xe   : > { %s361_s8 = sshll.u32 %s487_s7, 4 }
   0xf   : > { %s111_s11 = scalar_lea.vmem %s484_s0, %s361_s8  ;;  %s473_s14 = scalar_lea.vmem %s485_s1, %s361_s8 }
  0x10   : > { %v117_v0 = vld [vmem:[%s111_s11] sm:$0xff]  ;;  %v118_v1 = vld [vmem:[%s111_s11 + $0x8] sm:$0xff] }
  0x11   : > { %vm119_vm0 = vcmp.gt.f32.partialorder %v117_v0, 0.5  ;;  %vm120_vm1 = vcmp.gt.f32.partialorder %v118_v1, 0.5 }
  0x12   : > { %v121_v3 = vsel %vm119_vm0, 0.0, %v440_v2  ;;  %v122_v4 = vsel %vm120_vm1, 0.0, %v440_v2 }
  0x13   : > { %134 = vrot.lane.b32.xlu1 %v121_v3, %s441_s15  ;;  %125 = vrot.lane.b32.xlu0 %v121_v3, %s442_s16 }
  0x17   : > { %136 = vrot.lane.b32.xlu1 %v122_v4, %s441_s15  ;;  %127 = vrot.lane.b32.xlu0 %v122_v4, %s442_s16 }
  0x85   : > { %v135_v5 = vpop.permute.xlu1 %134  ;;  %v126_v6 = vpop.permute.xlu0 %125 }
  0x86   : > { %v141_v7 = vsel %vm140_vm2, %v135_v5, 1000000.0  ;;  %v132_v8 = vsel %vm131_vm3, 1000000.0, %v126_v6  ;;  %v432_v5 = vmov 4e+12  }
  0x87   : > { %v143_v9 = vmin.f32 %v132_v8, %v141_v7 }
  0x89   : > { %v145_v10 = vadd.f32 1.0, %v143_v9  ;;  %v137_v11 = vpop.permute.xlu1 %136  ;;  %v128_v12 = vpop.permute.xlu0 %127 }
  0x8a   : > { %v142_v13 = vsel %vm140_vm2, %v137_v11, 1000000.0  ;;  %v133_v14 = vsel %vm131_vm3, 1000000.0, %v128_v12 }
  0x8b   : > { %v144_v15 = vmin.f32 %v133_v14, %v142_v13  ;;  %v147_v16 = vmin.f32 %v121_v3, %v145_v10 }
  0x8d   : > { %v146_v17 = vadd.f32 1.0, %v144_v15  ;;  %151 = vrot.lane.b32.xlu0 %v147_v16, %s443_s17 }
  0x8f   : > { %v148_v18 = vmin.f32 %v122_v4, %v146_v17  ;;  %v428_v4 = vmov 4e+12  }
  0x91   : > { %160 = vrot.lane.b32.xlu0 %v147_v16, %s444_s18  ;;  %153 = vrot.lane.b32.xlu1 %v148_v18, %s443_s17 }
  0x95   : > { %162 = vrot.lane.b32.xlu1 %v148_v18, %s444_s18 }
  0xff   : > { %v152_v19 = vpop.permute.xlu0 %151 }
 0x100   : > { %v158_v22 = vsel %vm157_vm4, 1000000.0, %v152_v19 }
 0x103   : > { %v154_v20 = vpop.permute.xlu1 %153  ;;  %v161_v21 = vpop.permute.xlu0 %160 }
 0x104   : > { %v167_v23 = vsel %vm166_vm5, %v161_v21, 1000000.0  ;;  %v159_v27 = vsel %vm157_vm4, 1000000.0, %v154_v20 }
 0x105   : > { %v169_v24 = vmin.f32 %v158_v22, %v167_v23 }
 0x107   : > { %v171_v25 = vadd.f32 2.0, %v169_v24  ;;  %v163_v26 = vpop.permute.xlu1 %162 }
 0x108   : > { %v168_v28 = vsel %vm166_vm5, %v163_v26, 1000000.0 }
 0x109   : > { %v170_v29 = vmin.f32 %v159_v27, %v168_v28  ;;  %v173_v30 = vmin.f32 %v147_v16, %v171_v25 }
 0x10b   : > { %v172_v31 = vadd.f32 2.0, %v170_v29  ;;  %177 = vrot.lane.b32.xlu0 %v173_v30, %s445_s19 }
 0x10d   : > { %v174_v32 = vmin.f32 %v148_v18, %v172_v31 }
 0x10f   : > { %179 = vrot.lane.b32.xlu1 %v174_v32, %s445_s19  ;;  %186 = vrot.lane.b32.xlu0 %v173_v30, %s446_s20 }
 0x113   : > { %188 = vrot.lane.b32.xlu1 %v174_v32, %s446_s20 }
 0x17d   : > { %v178_v33 = vpop.permute.xlu0 %177 }
 0x17e   : > { %v184_v36 = vsel %vm183_vm6, 1000000.0, %v178_v33 }
 0x181   : > { %v180_v34 = vpop.permute.xlu1 %179  ;;  %v187_v35 = vpop.permute.xlu0 %186 }
 0x182   : > { %v193_v37 = vsel %vm192_vm7, %v187_v35, 1000000.0  ;;  %v185_v41 = vsel %vm183_vm6, 1000000.0, %v180_v34 }
 0x183   : > { %v195_v38 = vmin.f32 %v184_v36, %v193_v37 }
 0x185   : > { %v197_v39 = vadd.f32 4.0, %v195_v38  ;;  %v189_v40 = vpop.permute.xlu1 %188 }
 0x186   : > { %v194_v42 = vsel %vm192_vm7, %v189_v40, 1000000.0 }
 0x187   : > { %v196_v43 = vmin.f32 %v185_v41, %v194_v42  ;;  %v199_v44 = vmin.f32 %v173_v30, %v197_v39 }
 0x189   : > { %v198_v46 = vadd.f32 4.0, %v196_v43  ;;  %203 = vrot.lane.b32.xlu0 %v199_v44, %s447_s21 }
 0x18b   : > { %v200_v48 = vmin.f32 %v174_v32, %v198_v46 }
 0x18d   : > { %205 = vrot.lane.b32.xlu1 %v200_v48, %s447_s21  ;;  %212 = vrot.lane.b32.xlu0 %v199_v44, %s448_s22 }
 0x191   : > { %214 = vrot.lane.b32.xlu1 %v200_v48, %s448_s22 }
 0x1fb   : > { %v204_v52 = vpop.permute.xlu0 %203 }
 0x1fc   : > { %v210_v55 = vsel %vm209_vm8, 1000000.0, %v204_v52 }
 0x1ff   : > { %v206_v53 = vpop.permute.xlu1 %205  ;;  %v213_v54 = vpop.permute.xlu0 %212 }
 0x200   : > { %v218_v56 = vsel %vm209_vm8, %v213_v54, 1000000.0  ;;  %v211_v60 = vsel %vm209_vm8, 1000000.0, %v206_v53 }
 0x201   : > { %v220_v57 = vmin.f32 %v210_v55, %v218_v56 }
 0x203   : > { %v222_v58 = vadd.f32 8.0, %v220_v57  ;;  %v215_v59 = vpop.permute.xlu1 %214 }
 0x204   : > { %v219_v61 = vsel %vm209_vm8, %v215_v59, 1000000.0 }
 0x205   : > { %v224_v62 = vmin.f32 %v199_v44, %v222_v58  ;;  %v221_v63 = vmin.f32 %v211_v60, %v219_v61 }
 0x207   : > { %v226_v0 = vmul.f32 %v224_v62, %v224_v62  ;;  %v223_v1 = vadd.f32 8.0, %v221_v63 }
 0x209   : > { %229 = vst.msk [vmem:[#allocation2] sm:$0xff] %vm228_vm9, %v226_v0  ;;  %v225_v2 = vmin.f32 %v200_v48, %v223_v1 }
 0x20b   : > { %v227_v3 = vmul.f32 %v225_v2, %v225_v2 }
 0x20d   : > { %230 = vst.msk [vmem:[#allocation2 + $0x8] sm:$0xff] %vm228_vm9, %v227_v3 }
 0x20e LB: >> { %s244_s24 = scvt.s32.f32 %s438_s23  ;;  %s250_s25 = scalar_lea.vmem [#allocation2], %s438_s23  ;;  %s438_s23 = sphi %s436_s23, %s241_s23   ;;  %v434_v5 = vphi %v432_v5, %v433_v5   ;;  %v430_v4 = vphi %v428_v4, %v429_v4  }
 0x20f   : >> { %s241_s23 = sadd.s32 1, %s438_s23  }
 0x210   : >> { %v245_v6 = vstv %s244_s24  ;;  %p238_p4 = scmp.ge.s32.totalorder %s241_s23, 16  }
 0x211   : >> { %v246_v7 = vsub.f32 %v234_v50, %v245_v6  ;;  %v247_v8 = vsub.f32 %v235_v51, %v245_v6 }
 0x213   : >> { %v248_v10 = vmul.f32 %v246_v7, %v246_v7  ;;  %v249_v11 = vmul.f32 %v247_v8, %v247_v8  ;;  %240 = sbr.rel (!%p238_p4) target bundleno = 526 (0x20e), region = 62 }
 0x214   : >> { %v356_v9 = vld [vmem:[%s250_s25] ss:$0 sm:$0xff] }
 0x215   : >> { %v256_v12 = vadd.f32 %v356_v9, %v248_v10  ;;  %v257_v13 = vadd.f32 %v356_v9, %v249_v11 }
 0x217   : >> { %v258_v14 = vmin.f32 %v434_v5, %v256_v12   ;;  %v259_v15 = vmin.f32 %v430_v4, %v257_v13  }
 0x219   : >> { %v429_v4 = vmov %v259_v15   ;;  %v433_v5 = vmov %v258_v14   ;;  %404 = vrsqrt.f32 (%p238_p4), %v258_v14  ;;  %vm262_vm10 = vcmp.eq.f32.partialorder (%p238_p4), %v258_v14, inf }
 0x21a   : > { %406 = vrsqrt.f32 %v259_v15  ;;  %v265_v17 = vand.u32 2147483648, %v258_v14  ;;  %vm264_vm11 = vcmp.eq.f32.partialorder %v258_v14, 0.0  ;;  %vm269_vm12 = vcmp.eq.f32.partialorder %v259_v15, inf }
 0x21b   : > { %v272_v20 = vand.u32 2147483648, %v259_v15  ;;  %vm271_vm13 = vcmp.eq.f32.partialorder %v259_v15, 0.0 }
 0x223   : > { %v405_v16 = vpop.eup %404 }
 0x224   : > { %v407_v18 = vpop.eup %406  ;;  %v261_v19 = vmul.f32 %v405_v16, %v258_v14 }
 0x225   : > { %v268_v21 = vmul.f32 %v407_v18, %v259_v15 }
 0x226   : > { %v263_v22 = vsel %vm262_vm10, %v258_v14, %v261_v19 }
 0x227   : > { %v266_v23 = vsel %vm264_vm11, %v265_v17, %v263_v22  ;;  %v270_v24 = vsel %vm269_vm12, %v259_v15, %v268_v21 }
 0x228   : > { %v357_v25 = vadd.f32 -1.0, %v266_v23  ;;  %v273_v26 = vsel %vm271_vm13, %v272_v20, %v270_v24 }
 0x229   : > { %v358_v27 = vadd.f32 -1.0, %v273_v26 }
 0x22a   : > { %v276_v28 = vmax.f32 %v357_v25, 0.0 }
 0x22b   : > { %v277_v29 = vmax.f32 %v358_v27, 0.0 }
 0x22c   : > { %278 = vst.msk [vmem:[%s473_s14] sm:$0xff] %vm228_vm9, %v276_v28 }
 0x22d   : > { %279 = vst.msk [vmem:[%s473_s14 + $0x8] sm:$0xff] %vm228_vm9, %v277_v29 }
 0x22e PF: > { %s11_s6 = sadd.s32 1, %s426_s6  }
 0x22f   : > { %p8_p5 = scmp.ge.s32.totalorder %s11_s6, 4  }
 0x231   :  { %10 = sbr.rel (!%p8_p5) target bundleno = 1 (0x1), region = 73 }

// kernel: _abl_forward.6
= control target key start
LH: loop header
LB: loop body
LE: loop exit
PB: predicated region body
PF: predicated region fallthrough
CT: control target
= control target key end

     0   :  { %s388_s6 = smov 0   ;;  %s390_s7 = smov 0   ;;  %s449_s0 = inlined_call_operand.vmem [shape: f32[4,10,18], index: 0, kind: input, shape index: {}]   ;;  %s450_s1 = inlined_call_operand.vmem [shape: f32[2,16,16], index: 1, kind: output, shape index: {}]  }
   0x1   :  { %s392_s8 = smov 0   ;;  %s394_s9 = smov 0  }
   0x2   :  { %s396_s10 = smov 0  }
   0x3 LB: > { %s20_s11 = sadd.s32 1, %s365_s8  ;;  %s23_s12 = sadd.s32 1, %s369_s9  ;;  %s373_s10 = sphi %s396_s10, %s11_s10   ;;  %s369_s9 = sphi %s394_s9, %s454_s9   ;;  %s365_s8 = sphi %s392_s8, %s453_s8   ;;  %s361_s7 = sphi %s390_s7, %s452_s7   ;;  %s357_s6 = sphi %s388_s6, %s451_s6  }
   0x4   : > { %p21_p0 = scmp.ge.s32.totalorder %s20_s11, 2  ;;  %p282_p1 = scmp.ge.s32.totalorder %s373_s10, 1 }
   0x5   : > { %p109_p2 = scmp.lt.s32.totalorder %s373_s10, 5 }
   0x6   : > { %s456_s11 = smov (%p21_p0, %s20_s11), 0  ;;  %s458_s12 = smov (!%p21_p0, %s23_s12), %s369_s9 }
   0x7   : > { %p110_p3 = pnand %p282_p1, %p109_p2  ;;  %p25_p4 = scmp.ge.s32.totalorder %s458_s12, 2 }
   0x8   : > { %s283_s13 = sshll.u32 (!%p110_p3), %s361_s7, 1  ;;  %vm163_vm0 = vcmask (!%p110_p3), 1046528   ;;  %s375_s19 = smov (!%p110_p3), 127   ;;  %vm177_vm1 = vcmask (!%p110_p3), 1045504   ;;  %vm194_vm2 = vcmask (!%p110_p3), 130048   ;;  %v377_v22 = vmov (!%p110_p3), 0.0  }
   0x9   : > { %s460_s12 = smov (%p25_p4, %s458_s12), 0  ;;  %113 = sbr.rel (%p110_p3) target bundleno = 156 (0x9c), region = 24 }
   0xa   : > { %s135_s14 = sadd.s32 (!%p110_p3), %s357_s6, %s283_s13  ;;  %s376_s20 = smov (!%p110_p3), 126  }
   0xb   : > { %p136_p5 = scmp.lt.s32.totalorder (!%p110_p3), %s135_s14, 3  ;;  %p143_p6 = scmp.lt.s32.totalorder (!%p110_p3), %s361_s7, 1 }
   0xc   : > { %p145_p7 = scmp.lt.s32.totalorder (!%p110_p3), %s357_s6, 1 }
  0x10   : > { %s462_s14 = smov (!%p136_p5, %s135_s14), 3  ;;  %s464_s7 = smov (!%p143_p6, %s361_s7), 1 }
  0x11   : > { %s291_s15 = sshll.u32 %s462_s14, 4  ;;  %s466_s6 = smov (!%p145_p7, %s357_s6), 1 }
  0x12   : > { %s140_s18 = scalar_lea.vmem %s449_s0, %s291_s15  ;;  %s286_s21 = sshll.u32 %s464_s7, 1 }
  0x13   : > { %v151_v0 = vld [vmem:[%s140_s18] sm:$0xff]  ;;  %v152_v1 = vld [vmem:[%s140_s18 + $0x8] sm:$0x3]  ;;  %s148_s22 = sadd.s32 %s286_s21, %s466_s6 }
  0x14   : > { %154 = vrot.lane.b32.xlu0 %v151_v0, %s375_s19  ;;  %v164_v2 = vrot.slane %v151_v0, 1  ;;  %v165_v3 = vrot.slane %v152_v1, 1  ;;  %v178_v4 = vrot.slane %v151_v0, 2  ;;  %v179_v5 = vrot.slane %v152_v1, 2  ;;  %s287_s23 = sshll.u32 %s148_s22, 3 }
  0x15   : > { %s150_s26 = scalar_lea.vmem %s450_s1, %s287_s23 }
  0x16   : > { %v166_v6 = vsel %vm163_vm0, %v164_v2, %v165_v3  ;;  %v180_v7 = vsel %vm177_vm1, %v178_v4, %v179_v5 }
  0x17   : > { %169 = vrot.lane.b32.xlu1 %v166_v6, %s375_s19 }
  0x18   : > { %158 = vrot.lane.b32.xlu0 %v151_v0, %s376_s20 }
  0x1b   : > { %173 = vrot.lane.b32.xlu1 %v166_v6, %s376_s20 }
  0x1c   : > { %183 = vrot.lane.b32.xlu0 %v180_v7, %s375_s19 }
  0x1f   : > { %187 = vrot.lane.b32.xlu1 %v180_v7, %s376_s20 }
  0x86   : > { %v155_v8 = vpop.permute.xlu0 %154 }
  0x87   : > { %v157_v9 = vadd.f32 %v155_v8, %v151_v0 }
  0x89   : > { %v170_v10 = vpop.permute.xlu1 %169 }
  0x8a   : > { %v159_v11 = vpop.permute.xlu0 %158 }
  0x8b   : > { %v161_v12 = vadd.f32 %v159_v11, %v157_v9 }
  0x8d   : > { %v168_v13 = vadd.f32 %v166_v6, %v161_v12  ;;  %v174_v14 = vpop.permute.xlu1 %173 }
  0x8e   : > { %v184_v17 = vpop.permute.xlu0 %183 }
  0x8f   : > { %v172_v15 = vadd.f32 %v170_v10, %v168_v13 }
  0x91   : > { %v176_v16 = vadd.f32 %v174_v14, %v172_v15  ;;  %v188_v19 = vpop.permute.xlu1 %187 }
  0x93   : > { %v182_v18 = vadd.f32 %v180_v7, %v176_v16 }
  0x95   : > { %v186_v20 = vadd.f32 %v184_v17, %v182_v18 }
  0x97   : > { %v190_v21 = vadd.f32 %v188_v19, %v186_v20 }
  0x99   : > { %vm191_vm3 = vcmp.gt.f32.partialorder %v190_v21, 0.0 }
  0x9a   : > { %v288_v23 = vsel %vm191_vm3, 1.0, %v377_v22 }
  0x9b   : > { %195 = vst.msk [vmem:[%s150_s26] sm:$0xff] %vm194_vm2, %v288_v23 }
  0x9c PF: > { %s11_s10 = sadd.s32 1, %s373_s10   ;;  %s451_s6 = smov %s365_s8 }
  0x9d   : > { %p8_p8 = scmp.ge.s32.totalorder %s11_s10, 6   ;;  %s452_s7 = smov %s369_s9 }
  0x9e   : > { %s453_s8 = smov %s456_s11  ;;  %s454_s9 = smov %s460_s12 }
  0x9f   :  { %10 = sbr.rel (!%p8_p8) target bundleno = 3 (0x3), region = 54 }

// kernel: _abl_forward.7
= control target key start
LH: loop header
LB: loop body
LE: loop exit
PB: predicated region body
PF: predicated region fallthrough
CT: control target
= control target key end

     0   :  { %s1721_s15 = smov 0   ;;  %s1723_s16 = smov 0   ;;  %s2488_s0 = inlined_call_operand.vmem [shape: f32[4,4,10,18], index: 0, kind: input, shape index: {}]   ;;  %s2489_s1 = inlined_call_operand.vmem [shape: f32[4,10,18], index: 1, kind: input, shape index: {}]   ;;  %s2490_s2 = inlined_call_operand.vmem [shape: f32[2,16,16], index: 2, kind: input, shape index: {}]   ;;  %s2491_s3 = inlined_call_operand.vmem [shape: f32[2,16,16], index: 3, kind: output, shape index: {0}]   ;;  %s2492_s4 = inlined_call_operand.vmem [shape: f32[2,16,16], index: 4, kind: output, shape index: {1}]  }
   0x1   :  { %s1725_s17 = smov 0   ;;  %s1727_s18 = smov 0  }
   0x2   :  { %s1729_s19 = smov 0  }
   0x3 LB: > { %s24_s20 = sadd.s32 1, %s1680_s17  ;;  %s27_s21 = sadd.s32 1, %s1684_s18  ;;  %s1688_s19 = sphi %s1729_s19, %s15_s19   ;;  %s1684_s18 = sphi %s1727_s18, %s2496_s18   ;;  %s1680_s17 = sphi %s1725_s17, %s2495_s17   ;;  %s1676_s16 = sphi %s1723_s16, %s2494_s16   ;;  %s1672_s15 = sphi %s1721_s15, %s2493_s15  }
   0x4   : > { %p25_p0 = scmp.ge.s32.totalorder %s24_s20, 2  ;;  %p1493_p1 = scmp.ge.s32.totalorder %s1688_s19, 1 }
   0x5   : > { %p222_p2 = scmp.lt.s32.totalorder %s1688_s19, 5 }
   0x6   : > { %s2498_s20 = smov (%p25_p0, %s24_s20), 0  ;;  %s2500_s21 = smov (!%p25_p0, %s27_s21), %s1684_s18 }
   0x7   : > { %p223_p3 = pnand %p1493_p1, %p222_p2  ;;  %p29_p4 = scmp.ge.s32.totalorder %s2500_s21, 2 }
   0x8   : > { %s1494_s22 = sshll.u32 (!%p223_p3), %s1676_s16, 1  ;;  %vm329_vm0 = vcmask (!%p223_p3), 146432   ;;  %vm413_vm1 = vcmask (!%p223_p3), 1045504   ;;  %vm337_vm2 = vcmask (!%p223_p3), 140288   ;;  %v1690_v23 = vmov (!%p223_p3), 0   ;;  %s1691_s6 = smov (!%p223_p3), 127  }
   0x9   : > { %s2502_s21 = smov (%p29_p4, %s2500_s21), 0  ;;  %226 = sbr.rel (%p223_p3) target bundleno = 879 (0x36f), region = 32 }
   0xa   : > { %s277_s23 = sadd.s32 (!%p223_p3), %s1672_s15, %s1494_s22  ;;  %s1692_s7 = smov (!%p223_p3), 1   ;;  %vm455_vm4 = vcmask (!%p223_p3), 1046528   ;;  %vm532_vm7 = vcmask (!%p223_p3), 1040384   ;;  %vm701_vm8 = vcmask (!%p223_p3), 130049   ;;  %vm709_vm9 = vcmask (!%p223_p3), 122880  }
   0xb   : > { %p278_p5 = scmp.lt.s32.totalorder (!%p223_p3), %s277_s23, 3  ;;  %s1693_s8 = smov (!%p223_p3), 2   ;;  %vm820_vm11 = vcmask (!%p223_p3), 146449   ;;  %vm828_vm12 = vcmask (!%p223_p3), 139280   ;;  %vm919_vm13 = vcmask (!%p223_p3), 146448  }
   0xc   : > { %s1694_s9 = smov (!%p223_p3), 126   ;;  %p294_p6 = scmp.lt.s32.totalorder (!%p223_p3), %s1676_s16, 1 }
   0xd   : > { %p296_p7 = scmp.lt.s32.totalorder (!%p223_p3), %s1672_s15, 1 }
  0x10   : > { %s2504_s23 = smov (!%p278_p5, %s277_s23), 3  ;;  %s2506_s16 = smov (!%p294_p6, %s1676_s16), 1 }
  0x11   : > { %s1511_s24 = sshll.u32 %s2504_s23, 4  ;;  %s1510_s25 = sshll.u32 %s2504_s23, 6 }
  0x12   : > { %s1760_s28 = scalar_lea.vmem %s2489_s1, %s1511_s24  ;;  %s282_s5 = scalar_lea.vmem %s2488_s0, %s1510_s25 }
  0x13   : > { %v1766_v0 = vld [vmem:[%s1760_s28] sm:$0xff]  ;;  %v1769_v1 = vld [vmem:[%s1760_s28 + $0x8] sm:$0x3]  ;;  %v320_v5 = vld [vmem:[%s282_s5 + $0x10] sm:$0xff]  ;;  %s2508_s15 = smov (!%p296_p7, %s1672_s15), 1  ;;  %s1500_s10 = sshll.u32 %s2506_s16, 1 }
  0x14   : > { %v318_v2 = vld [vmem:[%s282_s5] sm:$0xff]  ;;  %v414_v3 = vrot.slane %v1766_v0, 2  ;;  %v415_v4 = vrot.slane %v1769_v1, 2  ;;  %v321_v6 = vld [vmem:[%s282_s5 + $0x18] sm:$0x3]  ;;  %v324_v8 = vld [vmem:[%s282_s5 + $0x30] sm:$0xff]  ;;  %s299_s11 = sadd.s32 %s1500_s10, %s2508_s15 }
  0x15   : > { %v322_v7 = vld [vmem:[%s282_s5 + $0x20] sm:$0xff]  ;;  %v325_v9 = vld [vmem:[%s282_s5 + $0x38] sm:$0x3]  ;;  %v330_v10 = vsel %vm329_vm0, %v318_v2, -inf  ;;  %v331_v11 = vsel %vm329_vm0, %v320_v5, -inf  ;;  %v334_v15 = vsel %vm329_vm0, %v324_v8, -inf }
  0x16   : > { %v332_v12 = vsel %vm329_vm0, %v322_v7, -inf  ;;  %v416_v13 = vsel %vm413_vm1, %v414_v3, %v415_v4  ;;  %v319_v16 = vld [vmem:[%s282_s5 + $0x8] sm:$0x3]  ;;  %v339_v18 = vsel %vm337_vm2, %v321_v6, -inf  ;;  %v335_v19 = vmax.f32 %v331_v11, %v334_v15  ;;  %s2395_s12 = sshll.u32 %s299_s11, 3 }
  0x17   : > { %v333_v14 = vmax.f32 %v330_v10, %v332_v12  ;;  %v323_v17 = vld [vmem:[%s282_s5 + $0x28] sm:$0x3]  ;;  %vm418_vm3 = vcmp.lt.f32.partialorder %v1766_v0, %v416_v13  ;;  %v338_v20 = vsel %vm337_vm2, %v319_v16, -inf  ;;  %v342_v26 = vsel %vm337_vm2, %v325_v9, -inf  ;;  %s301_s15 = scalar_lea.vmem %s2490_s2, %s2395_s12  ;;  %s317_s23 = scalar_lea.vmem %s2492_s4, %s2395_s12 }
  0x18   : > { %v340_v21 = vsel %vm337_vm2, %v323_v17, -inf  ;;  %v420_v22 = vsel %vm418_vm3, %v1766_v0, %v416_v13  ;;  %v419_v24 = vsel %vm418_vm3, 1, %v1690_v23  ;;  %v343_v29 = vmax.f32 %v339_v18, %v342_v26  ;;  %s309_s26 = scalar_lea.vmem %s2491_s3, %s2395_s12 }
  0x19   : > { %v341_v25 = vmax.f32 %v338_v20, %v340_v21  ;;  %v422_v27 = vrot.slane %v420_v22, 7  ;;  %v336_v28 = vmax.f32 %v333_v14, %v335_v19  ;;  %v428_v30 = vrot.slane %v419_v24, 7 }
  0x1a   : > { %vm1010_vm3 = vcmask 146450  }
  0x1b   : > { %423 = vrot.lane.b32.xlu0 %v422_v27, %s1691_s6  ;;  %v345_v31 = vsub.f32 %v318_v2, %v336_v28  ;;  %v347_v32 = vsub.f32 %v320_v5, %v336_v28  ;;  %v349_v33 = vsub.f32 %v322_v7, %v336_v28  ;;  %v351_v34 = vsub.f32 %v324_v8, %v336_v28 }
  0x1c   : > { %v344_v35 = vmax.f32 %v341_v25, %v343_v29 }
  0x1d   : > { %v353_v36 = vmul.f32 1.442695, %v345_v31  ;;  %v357_v37 = vmul.f32 1.442695, %v347_v32  ;;  %v361_v38 = vmul.f32 1.442695, %v349_v33 }
  0x1e   : > { %v365_v39 = vmul.f32 1.442695, %v351_v34  ;;  %v346_v40 = vsub.f32 %v319_v16, %v344_v35  ;;  %v348_v41 = vsub.f32 %v321_v6, %v344_v35  ;;  %v350_v42 = vsub.f32 %v323_v17, %v344_v35 }
  0x1f   : > { %1558 = vpow2.f32 %v353_v36  ;;  %429 = vrot.lane.b32.xlu0 %v428_v30, %s1691_s6  ;;  %v352_v43 = vsub.f32 %v325_v9, %v344_v35 }
  0x20   : > { %1560 = vpow2.f32 %v357_v37  ;;  %v355_v44 = vmul.f32 1.442695, %v346_v40  ;;  %v359_v45 = vmul.f32 1.442695, %v348_v41  ;;  %v363_v46 = vmul.f32 1.442695, %v350_v42 }
  0x21   : > { %1562 = vpow2.f32 %v361_v38  ;;  %v367_v47 = vmul.f32 1.442695, %v352_v43 }
  0x22   : > { %1564 = vpow2.f32 %v365_v39 }
  0x23   : > { %1566 = vpow2.f32 %v355_v44 }
  0x24   : > { %1568 = vpow2.f32 %v359_v45 }
  0x25   : > { %1570 = vpow2.f32 %v363_v46 }
  0x26   : > { %1572 = vpow2.f32 %v367_v47 }
  0x29   : > { %v1559_v48 = vpop.eup %1558 }
  0x2a   : > { %v1561_v49 = vpop.eup %1560  ;;  %v369_v50 = vsel %vm329_vm0, %v1559_v48, 0.0 }
  0x2b   : > { %v1563_v51 = vpop.eup %1562  ;;  %v370_v52 = vsel %vm329_vm0, %v1561_v49, 0.0 }
  0x2c   : > { %v1565_v53 = vpop.eup %1564  ;;  %v371_v54 = vadd.f32 %v370_v52, %v369_v50  ;;  %v372_v55 = vsel %vm329_vm0, %v1563_v51, 0.0 }
  0x2d   : > { %v1567_v56 = vpop.eup %1566  ;;  %v374_v57 = vsel %vm329_vm0, %v1565_v53, 0.0 }
  0x2e   : > { %v1569_v58 = vpop.eup %1568  ;;  %v373_v59 = vadd.f32 %v372_v55, %v371_v54  ;;  %v376_v60 = vsel %vm337_vm2, %v1567_v56, 0.0 }
  0x2f   : > { %v1571_v61 = vpop.eup %1570  ;;  %v377_v62 = vsel %vm337_vm2, %v1569_v58, 0.0 }
  0x30   : > { %v1573_v63 = vpop.eup %1572  ;;  %v375_v2 = vadd.f32 %v374_v57, %v373_v59  ;;  %v378_v3 = vadd.f32 %v377_v62, %v376_v60  ;;  %v379_v4 = vsel %vm337_vm2, %v1571_v61, 0.0 }
  0x31   : > { %v381_v5 = vsel %vm337_vm2, %v1573_v63, 0.0 }
  0x32   : > { %1574 = vlog2.f32 %v375_v2  ;;  %v380_v6 = vadd.f32 %v379_v4, %v378_v3 }
  0x34   : > { %v382_v7 = vadd.f32 %v381_v5, %v380_v6 }
  0x36   : > { %1576 = vlog2.f32 %v382_v7 }
  0x3c   : > { %v1575_v8 = vpop.eup %1574 }
  0x3d   : > { %v384_v9 = vmul.f32 0.6931472, %v1575_v8 }
  0x3f   : > { %v1794_v10 = vsub.f32 %v345_v31, %v384_v9  ;;  %v1796_v12 = vsub.f32 %v347_v32, %v384_v9  ;;  %v1802_v15 = vsub.f32 %v349_v33, %v384_v9  ;;  %v1810_v17 = vsub.f32 %v351_v34, %v384_v9 }
  0x40   : > { %v1577_v11 = vpop.eup %1576 }
  0x41   : > { %v386_v13 = vmul.f32 0.6931472, %v1577_v11  ;;  %661 = vrot.lane.b32.xlu0 %v1794_v10, %s1691_s6  ;;  %v596_v20 = vrot.slane %v1794_v10, 1  ;;  %v599_v22 = vrot.slane %v1796_v12, 1  ;;  %v602_v28 = vrot.slane %v1802_v15, 1 }
  0x42   : > { %v605_v34 = vrot.slane %v1810_v17, 1  ;;  %v1870_v37 = vrot.slane %v1794_v10, 7  ;;  %v1899_v44 = vrot.slane %v1802_v15, 7  ;;  %v1909_v46 = vrot.slane %v1810_v17, 7 }
  0x43   : > { %v1800_v14 = vsub.f32 %v346_v40, %v386_v13  ;;  %v1806_v16 = vsub.f32 %v348_v41, %v386_v13  ;;  %v1814_v18 = vsub.f32 %v350_v42, %v386_v13  ;;  %v1820_v19 = vsub.f32 %v352_v43, %v386_v13 }
  0x44   : > { %v1879_v40 = vrot.slane %v1796_v12, 7  ;;  %v399_v57 = vmul.f32 1.442695, %v1796_v12  ;;  %v395_v59 = vmul.f32 1.442695, %v1794_v10 }
  0x45   : > { %663 = vrot.lane.b32.xlu1 %v1800_v14, %s1691_s6  ;;  %665 = vrot.lane.b32.xlu0 %v1796_v12, %s1691_s6  ;;  %v597_v21 = vrot.slane %v1800_v14, 1  ;;  %v600_v23 = vrot.slane %v1806_v16, 1  ;;  %v603_v29 = vrot.slane %v1814_v18, 1  ;;  %v606_v35 = vrot.slane %v1820_v19, 1 }
  0x46   : > { %v534_v39 = vrot.slane %v1800_v14, 7  ;;  %v537_v42 = vrot.slane %v1806_v16, 7  ;;  %v540_v45 = vrot.slane %v1814_v18, 7  ;;  %v543_v47 = vrot.slane %v1820_v19, 7 }
  0x47   : > { %v1845_v24 = vsel %vm455_vm4, %v596_v20, %v597_v21  ;;  %v1852_v25 = vsel %vm455_vm4, %v599_v22, %v600_v23  ;;  %v1863_v33 = vsel %vm455_vm4, %v602_v28, %v603_v29  ;;  %v1873_v38 = vsel %vm455_vm4, %v605_v34, %v606_v35 }
  0x48   : > { %v1885_v41 = vsel %vm532_vm7, %v1870_v37, %v534_v39  ;;  %v1894_v43 = vsel %vm532_vm7, %v1879_v40, %v537_v42  ;;  %v1914_v48 = vsel %vm532_vm7, %v1899_v44, %v540_v45  ;;  %v1922_v49 = vsel %vm532_vm7, %v1909_v46, %v543_v47 }
  0x49   : > { %667 = vrot.lane.b32.xlu1 %v1806_v16, %s1691_s6  ;;  %669 = vrot.lane.b32.xlu0 %v1802_v15, %s1691_s6  ;;  %v397_v61 = vmul.f32 1.442695, %v1800_v14  ;;  %v401_v62 = vmul.f32 1.442695, %v1806_v16  ;;  %1578 = vpow2.f32 %v399_v57  ;;  %v403_v63 = vmul.f32 1.442695, %v1802_v15 }
  0x4a   : > { %1580 = vpow2.f32 %v395_v59  ;;  %v405_v3 = vmul.f32 1.442695, %v1814_v18  ;;  %v407_v5 = vmul.f32 1.442695, %v1810_v17  ;;  %v409_v6 = vmul.f32 1.442695, %v1820_v19 }
  0x4b   : > { %1582 = vpow2.f32 %v397_v61 }
  0x4c   : > { %1584 = vpow2.f32 %v401_v62 }
  0x4d   : > { %671 = vrot.lane.b32.xlu1 %v1814_v18, %s1691_s6  ;;  %673 = vrot.lane.b32.xlu0 %v1810_v17, %s1691_s6  ;;  %1586 = vpow2.f32 %v403_v63 }
  0x4e   : > { %1588 = vpow2.f32 %v405_v3 }
  0x4f   : > { %1590 = vpow2.f32 %v407_v5 }
  0x50   : > { %1592 = vpow2.f32 %v409_v6 }
  0x51   : > { %675 = vrot.lane.b32.xlu1 %v1820_v19, %s1691_s6  ;;  %780 = vrot.lane.b32.xlu0 %v1794_v10, %s1692_s7 }
  0x53   : > { %v1962_v9 = vpop.eup %1578 }
  0x54   : > { %v1966_v20 = vpop.eup %1580 }
  0x55   : > { %782 = vrot.lane.b32.xlu1 %v1800_v14, %s1692_s7  ;;  %784 = vrot.lane.b32.xlu0 %v1796_v12, %s1692_s7  ;;  %v1968_v21 = vpop.eup %1582 }
  0x59   : > { %786 = vrot.lane.b32.xlu1 %v1806_v16, %s1692_s7  ;;  %788 = vrot.lane.b32.xlu0 %v1802_v15, %s1692_s7 }
  0x5d   : > { %790 = vrot.lane.b32.xlu1 %v1814_v18, %s1692_s7  ;;  %792 = vrot.lane.b32.xlu0 %v1810_v17, %s1692_s7 }
  0x61   : > { %794 = vrot.lane.b32.xlu1 %v1820_v19, %s1692_s7  ;;  %899 = vrot.lane.b32.xlu0 %v1845_v24, %s1692_s7 }
  0x65   : > { %901 = vrot.lane.b32.xlu1 %v1852_v25, %s1692_s7 }
  0x8d   : > { %v424_v26 = vpop.permute.xlu0 %423 }
  0x8e   : > { %vm426_vm5 = vcmp.lt.f32.partialorder %v1766_v0, %v424_v26  ;;  %vm427_vm6 = vcmp.lt.f32.partialorder %v1769_v1, %v424_v26 }
  0x8f   : > { %v433_v27 = vsel %vm426_vm5, %v1766_v0, %v424_v26  ;;  %v434_v32 = vsel %vm427_vm6, %v1769_v1, %v424_v26  ;;  %v1972_v26 = vpop.eup %1584 }
  0x90   : > { %437 = vrot.lane.b32.xlu1 %v433_v27, %s1693_s8 }
  0x91   : > { %v430_v30 = vpop.permute.xlu0 %429 }
  0x92   : > { %v431_v31 = vsel %vm426_vm5, 2, %v430_v30  ;;  %v432_v36 = vsel %vm427_vm6, 2, %v430_v30  ;;  %vm1018_vm5 = vcmask 140304   ;;  %vm1103_vm6 = vcmask 130048  }
  0x93   : > { %445 = vrot.lane.b32.xlu0 %v431_v31, %s1693_s8  ;;  %v1977_v31 = vpop.eup %1586 }
  0x94   : > { %439 = vrot.lane.b32.xlu1 %v434_v32, %s1693_s8  ;;  %v1984_v39 = vpop.eup %1588 }
  0x97   : > { %903 = vrot.lane.b32.xlu0 %v1863_v33, %s1692_s7 }
  0x98   : > { %447 = vrot.lane.b32.xlu1 %v432_v36, %s1693_s8 }
  0x9b   : > { %970 = vrot.lane.b32.xlu0 %v1870_v37, %s1692_s7 }
  0x9c   : > { %905 = vrot.lane.b32.xlu1 %v1873_v38, %s1692_s7 }
  0x9f   : > { %974 = vrot.lane.b32.xlu0 %v1879_v40, %s1692_s7 }
  0xa0   : > { %972 = vrot.lane.b32.xlu1 %v1885_v41, %s1692_s7 }
  0xa3   : > { %1083 = vrot.lane.b32.xlu0 %v1845_v24, %s1691_s6 }
  0xa4   : > { %976 = vrot.lane.b32.xlu1 %v1894_v43, %s1692_s7 }
  0xa7   : > { %978 = vrot.lane.b32.xlu0 %v1899_v44, %s1692_s7 }
  0xa8   : > { %1085 = vrot.lane.b32.xlu1 %v1852_v25, %s1691_s6 }
  0xab   : > { %1087 = vrot.lane.b32.xlu0 %v1863_v33, %s1691_s6 }
  0xac   : > { %980 = vrot.lane.b32.xlu1 %v1914_v48, %s1692_s7 }
  0xaf   : > { %984 = vrot.lane.b32.xlu0 %v1922_v49, %s1692_s7 }
  0xb0   : > { %982 = vrot.lane.b32.xlu1 %v1909_v46, %s1692_s7 }
  0xb3   : > { %1154 = vrot.lane.b32.xlu0 %v1870_v37, %s1691_s6  ;;  %v662_v51 = vpop.permute.xlu0 %661 }
  0xb4   : > { %1089 = vrot.lane.b32.xlu1 %v1873_v38, %s1691_s6  ;;  %v685_v11 = vsub.f32 %v1794_v10, %v662_v51  ;;  %v1990_v51 = vpop.eup %1590 }
  0xb5   : > { %v1999_v61 = vpop.eup %1592 }
  0xb6   : > { %v693_v27 = vmul.f32 %v1966_v20, %v685_v11 }
  0xb7   : > { %1158 = vrot.lane.b32.xlu0 %v1879_v40, %s1691_s6  ;;  %v664_v50 = vpop.permute.xlu1 %663  ;;  %v666_v53 = vpop.permute.xlu0 %665 }
  0xb8   : > { %1156 = vrot.lane.b32.xlu1 %v1885_v41, %s1691_s6  ;;  %v687_v13 = vsub.f32 %v1796_v12, %v666_v53  ;;  %v686_v22 = vsub.f32 %v1800_v14, %v664_v50  ;;  %v702_v42 = vsel %vm701_vm8, %v693_v27, 0.0 }
  0xba   : > { %v695_v28 = vmul.f32 %v1962_v9, %v687_v13  ;;  %v694_v34 = vmul.f32 %v1968_v21, %v686_v22 }
  0xbb   : > { %1162 = vrot.lane.b32.xlu0 %v1899_v44, %s1691_s6  ;;  %v668_v52 = vpop.permute.xlu1 %667  ;;  %v670_v55 = vpop.permute.xlu0 %669 }
  0xbc   : > { %1160 = vrot.lane.b32.xlu1 %v1894_v43, %s1691_s6  ;;  %v688_v23 = vsub.f32 %v1806_v16, %v668_v52  ;;  %v689_v29 = vsub.f32 %v1802_v15, %v670_v55  ;;  %v703_v45 = vsel %vm701_vm8, %v695_v28, 0.0  ;;  %v710_v53 = vsel %vm709_vm9, %v694_v34, 0.0 }
  0xbd   : > { %v704_v62 = vadd.f32 %v703_v45, %v702_v42 }
  0xbe   : > { %v696_v35 = vmul.f32 %v1972_v26, %v688_v23  ;;  %v697_v47 = vmul.f32 %v1977_v31, %v689_v29 }
  0xbf   : > { %1166 = vrot.lane.b32.xlu0 %v1909_v46, %s1691_s6  ;;  %v672_v54 = vpop.permute.xlu1 %671  ;;  %v674_v58 = vpop.permute.xlu0 %673 }
  0xc0   : > { %1164 = vrot.lane.b32.xlu1 %v1914_v48, %s1691_s6  ;;  %v690_v36 = vsub.f32 %v1814_v18, %v672_v54  ;;  %v691_v50 = vsub.f32 %v1810_v17, %v674_v58  ;;  %v711_v55 = vsel %vm709_vm9, %v696_v35, 0.0  ;;  %v705_v63 = vsel %vm701_vm8, %v697_v47, 0.0 }
  0xc1   : > { %v712_v6 = vadd.f32 %v711_v55, %v710_v53  ;;  %v706_v23 = vadd.f32 %v705_v63, %v704_v62 }
  0xc2   : > { %v698_v54 = vmul.f32 %v1984_v39, %v690_v36  ;;  %v699_v58 = vmul.f32 %v1990_v51, %v691_v50 }
  0xc3   : > { %v1946_v56 = vpop.permute.xlu1 %675  ;;  %v781_v2 = vpop.permute.xlu0 %780 }
  0xc4   : > { %1168 = vrot.lane.b32.xlu1 %v1922_v49, %s1691_s6  ;;  %v692_v57 = vsub.f32 %v1820_v19, %v1946_v56  ;;  %v804_v3 = vsub.f32 %v1794_v10, %v781_v2  ;;  %v713_v11 = vsel %vm709_vm9, %v698_v54, 0.0  ;;  %v707_v29 = vsel %vm701_vm8, %v699_v58, 0.0 }
  0xc5   : > { %v714_v34 = vadd.f32 %v713_v11, %v712_v6  ;;  %v2019_v42 = vadd.f32 %v707_v29, %v706_v23  ;;  %vm1194_vm8 = vcmask 130050  }
  0xc6   : > { %v700_v13 = vmul.f32 %v1999_v61, %v692_v57  ;;  %v812_v2 = vmul.f32 %v1966_v20, %v804_v3 }
  0xc7   : > { %v1950_v60 = vpop.permute.xlu1 %782  ;;  %v785_v7 = vpop.permute.xlu0 %784 }
  0xc8   : > { %v806_v5 = vsub.f32 %v1796_v12, %v785_v7  ;;  %v805_v56 = vsub.f32 %v1800_v14, %v1950_v60  ;;  %v715_v60 = vsel %vm709_vm9, %v700_v13, 0.0  ;;  %v821_v55 = vsel %vm820_vm11, %v812_v2, 0.0 }
  0xc9   : > { %v2030_v54 = vadd.f32 %v715_v60, %v714_v34  ;;  %vm1202_vm9 = vcmask 123904  }
  0xca   : > { %v814_v7 = vmul.f32 %v1962_v9, %v806_v5  ;;  %v813_v45 = vmul.f32 %v1968_v21, %v805_v56 }
  0xcb   : > { %v1956_v4 = vpop.permute.xlu1 %786  ;;  %v789_v30 = vpop.permute.xlu0 %788 }
  0xcc   : > { %v807_v27 = vsub.f32 %v1806_v16, %v1956_v4  ;;  %v808_v36 = vsub.f32 %v1802_v15, %v789_v30  ;;  %v829_v11 = vsel %vm828_vm12, %v813_v45, 0.0 }
  0xce   : > { %v815_v47 = vmul.f32 %v1972_v26, %v807_v27  ;;  %v816_v62 = vmul.f32 %v1977_v31, %v808_v36 }
  0xcf   : > { %v1960_v8 = vpop.permute.xlu1 %790  ;;  %v793_v59 = vpop.permute.xlu0 %792 }
  0xd0   : > { %v809_v35 = vsub.f32 %v1814_v18, %v1960_v8  ;;  %v822_v8 = vsel %vm820_vm11, %v814_v7, 0.0  ;;  %v810_v30 = vsub.f32 %v1810_v17, %v793_v59  ;;  %v830_v13 = vsel %vm828_vm12, %v815_v47, 0.0 }
  0xd1   : > { %v823_v23 = vadd.f32 %v822_v8, %v821_v55  ;;  %v824_v7 = vsel %vm820_vm11, %v816_v62, 0.0  ;;  %v831_v36 = vadd.f32 %v830_v13, %v829_v11 }
  0xd2   : > { %v817_v57 = vmul.f32 %v1984_v39, %v809_v35  ;;  %v818_v29 = vmul.f32 %v1990_v51, %v810_v30 }
  0xd3   : > { %v1979_v32 = vpop.permute.xlu1 %794  ;;  %v900_v22 = vpop.permute.xlu0 %899  ;;  %v825_v8 = vadd.f32 %v824_v7, %v823_v23 }
  0xd4   : > { %v811_v58 = vsub.f32 %v1820_v19, %v1979_v32  ;;  %v911_v56 = vsub.f32 %v1794_v10, %v900_v22  ;;  %v832_v22 = vsel %vm828_vm12, %v817_v57, 0.0  ;;  %v826_v30 = vsel %vm820_vm11, %v818_v29, 0.0 }
  0xd5   : > { %vm569_vm11 = vcmask 138250  }
  0xd6   : > { %v819_v60 = vmul.f32 %v1999_v61, %v811_v58 }
  0xd7   : > { %v1992_v52 = vpop.permute.xlu1 %901 }
  0xd8   : > { %v912_v2 = vsub.f32 %v1796_v12, %v1992_v52  ;;  %v915_v52 = vmul.f32 %v1966_v20, %v911_v56 }
  0xda   : > { %v916_v62 = vmul.f32 %v1962_v9, %v912_v2  ;;  %v920_v13 = vsel %vm919_vm13, %v915_v52, 0.0 }
  0xdc   : > { %v921_v2 = vsel %vm919_vm13, %v916_v62, 0.0 }
 0x102   : > { %v438_v28 = vpop.permute.xlu1 %437 }
 0x103   : > { %vm443_vm10 = vcmp.lt.f32.partialorder %v1766_v0, %v438_v28 }
 0x104   : > { %v451_v50 = vsel %vm443_vm10, %v1766_v0, %v438_v28 }
 0x105   : > { %v446_v4 = vpop.permute.xlu0 %445  ;;  %v456_v3 = vrot.slane %v451_v50, 1 }
 0x106   : > { %v440_v53 = vpop.permute.xlu1 %439  ;;  %v449_v59 = vsel %vm443_vm10, 3, %v446_v4  ;;  %vm620_vm10 = vcmask 138248  }
 0x107   : > { %vm444_vm14 = vcmp.lt.f32.partialorder %v1769_v1, %v440_v53  ;;  %v461_v34 = vrot.slane %v449_v59, 1  ;;  %v834_v59 = vsel %vm828_vm12, %v819_v60, 0.0  ;;  %vm577_vm12 = vcmask 132104  }
 0x108   : > { %v452_v63 = vsel %vm444_vm14, %v1769_v1, %v440_v53 }
 0x109   : > { %v904_v5 = vpop.permute.xlu0 %903  ;;  %v457_v6 = vrot.slane %v452_v63, 1 }
 0x10a   : > { %v448_v27 = vpop.permute.xlu1 %447  ;;  %v913_v47 = vsub.f32 %v1802_v15, %v904_v5 }
 0x10b   : > { %v458_v32 = vsel %vm455_vm4, %v456_v3, %v457_v6  ;;  %v450_v28 = vsel %vm444_vm14, 3, %v448_v27  ;;  %v833_v3 = vadd.f32 %v832_v22, %v831_v36 }
 0x10c   : > { %vm460_vm15 = vcmp.lt.f32.partialorder %v1766_v0, %v458_v32  ;;  %v462_v35 = vrot.slane %v450_v28, 1  ;;  %v917_v23 = vmul.f32 %v1977_v31, %v913_v47  ;;  %v2074_v47 = vadd.f32 %v826_v30, %v825_v8 }
 0x10d   : > { %v465_v4 = vsel %vm460_vm15, %v1766_v0, %v458_v32  ;;  %v971_v45 = vpop.permute.xlu0 %970  ;;  %v2079_v62 = vadd.f32 %v834_v59, %v833_v3 }
 0x10e   : > { %v467_v50 = vrot.slane %v465_v4, 6  ;;  %v463_v53 = vsel %vm455_vm4, %v461_v34, %v462_v35  ;;  %v906_v55 = vpop.permute.xlu1 %905  ;;  %v994_v32 = vsub.f32 %v1794_v10, %v971_v45 }
 0x10f   : > { %v464_v63 = vsel %vm460_vm15, 4, %v463_v53  ;;  %v914_v58 = vsub.f32 %v1810_v17, %v906_v55  ;;  %v719_v53 = vrot.slane %v2019_v42, 7  ;;  %v720_v55 = vrot.slane %v2030_v54, 7 }
 0x110   : > { %v471_v57 = vrot.slane %v464_v63, 6  ;;  %vm469_vm0 = vcmp.lt.f32.partialorder %v1766_v0, %v467_v50  ;;  %vm470_vm2 = vcmp.lt.f32.partialorder %v1769_v1, %v467_v50  ;;  %v922_v63 = vadd.f32 %v921_v2, %v920_v13 }
 0x111   : > { %v975_v5 = vpop.permute.xlu0 %974  ;;  %v474_v6 = vsel %vm469_vm0, %v1766_v0, %v467_v50  ;;  %v475_v11 = vsel %vm470_vm2, %v1769_v1, %v467_v50  ;;  %v918_v34 = vmul.f32 %v1990_v51, %v914_v58  ;;  %v923_v50 = vsel %vm919_vm13, %v917_v23, 0.0 }
 0x112   : > { %v973_v56 = vpop.permute.xlu1 %972  ;;  %v478_v27 = vrot.slane %v474_v6, 2  ;;  %v479_v29 = vrot.slane %v475_v11, 2  ;;  %v472_v28 = vsel %vm469_vm0, 5, %v471_v57  ;;  %v473_v7 = vsel %vm470_vm2, 5, %v471_v57 }
 0x113   : > { %v996_v35 = vsub.f32 %v1796_v12, %v975_v5  ;;  %v485_v22 = vrot.slane %v472_v28, 2  ;;  %v995_v60 = vsub.f32 %v1800_v14, %v973_v56  ;;  %v486_v52 = vrot.slane %v473_v7, 2 }
 0x114   : > { %v480_v36 = vsel %vm413_vm1, %v478_v27, %v479_v29  ;;  %v1002_v5 = vmul.f32 %v1966_v20, %v994_v32  ;;  %v925_v6 = vsel %vm919_vm13, %v918_v34, 0.0  ;;  %v924_v11 = vadd.f32 %v923_v50, %v922_v63 }
 0x115   : > { %481 = vrot.lane.b32.xlu0 %v480_v36, %s1694_s9  ;;  %v1084_v4 = vpop.permute.xlu0 %1083  ;;  %v487_v57 = vsel %vm413_vm1, %v485_v22, %v486_v52  ;;  %v1004_v8 = vmul.f32 %v1962_v9, %v996_v35  ;;  %v1003_v23 = vmul.f32 %v1968_v21, %v995_v60  ;;  %v721_v27 = vsel %vm532_vm7, %v719_v53, %v720_v55 }
 0x116   : > { %v977_v45 = vpop.permute.xlu1 %976  ;;  %v1095_v30 = vsub.f32 %v1794_v10, %v1084_v4  ;;  %488 = vrot.lane.b32.xlu1 %v487_v57, %s1694_s9  ;;  %v2092_v29 = vadd.f32 %v925_v6, %v924_v11  ;;  %v838_v32 = vrot.slane %v2074_v47, 7  ;;  %v839_v28 = vrot.slane %v2079_v62, 7 }
 0x117   : > { %v997_v58 = vsub.f32 %v1806_v16, %v977_v45  ;;  %v1011_v7 = vsel %vm1010_vm3, %v1002_v5, 0.0  ;;  %v1012_v34 = vsel %vm1010_vm3, %v1004_v8, 0.0  ;;  %v1019_v36 = vsel %vm1018_vm5, %v1003_v23, 0.0 }
 0x118   : > { %v1099_v35 = vmul.f32 %v1966_v20, %v1095_v30  ;;  %v840_v55 = vsel %vm532_vm7, %v838_v32, %v839_v28  ;;  %v928_v63 = vrot.slane %v2092_v29, 6  ;;  %v1013_v57 = vadd.f32 %v1012_v34, %v1011_v7 }
 0x119   : > { %v1005_v3 = vmul.f32 %v1972_v26, %v997_v58  ;;  %v979_v59 = vpop.permute.xlu0 %978  ;;  %722 = vrot.lane.b32.xlu0 %v719_v53, %s1692_s7 }
 0x11a   : > { %v998_v13 = vsub.f32 %v1802_v15, %v979_v59  ;;  %v1086_v56 = vpop.permute.xlu1 %1085  ;;  %724 = vrot.lane.b32.xlu1 %v721_v27, %s1692_s7  ;;  %v1104_v58 = vsel %vm1103_vm6, %v1099_v35, 0.0 }
 0x11b   : > { %v1096_v2 = vsub.f32 %v1796_v12, %v1086_v56  ;;  %v1020_v22 = vsel %vm1018_vm5, %v1005_v3, 0.0 }
 0x11c   : > { %v1006_v60 = vmul.f32 %v1977_v31, %v998_v13  ;;  %v1021_v5 = vadd.f32 %v1020_v22, %v1019_v36 }
 0x11d   : > { %v1100_v4 = vmul.f32 %v1962_v9, %v1096_v2  ;;  %v1088_v52 = vpop.permute.xlu0 %1087  ;;  %841 = vrot.lane.b32.xlu0 %v838_v32, %s1691_s6 }
 0x11e   : > { %v1097_v50 = vsub.f32 %v1802_v15, %v1088_v52  ;;  %v981_v45 = vpop.permute.xlu1 %980  ;;  %843 = vrot.lane.b32.xlu1 %v840_v55, %s1691_s6  ;;  %v1014_v6 = vsel %vm1010_vm3, %v1006_v60, 0.0 }
 0x11f   : > { %v999_v53 = vsub.f32 %v1814_v18, %v981_v45  ;;  %v1105_v8 = vsel %vm1103_vm6, %v1100_v4, 0.0  ;;  %v1015_v27 = vadd.f32 %v1014_v6, %v1013_v57 }
 0x120   : > { %v1101_v30 = vmul.f32 %v1977_v31, %v1097_v50  ;;  %v1106_v2 = vadd.f32 %v1105_v8, %v1104_v58 }
 0x121   : > { %v1007_v11 = vmul.f32 %v1984_v39, %v999_v53  ;;  %v985_v23 = vpop.permute.xlu0 %984  ;;  %929 = vrot.lane.b32.xlu0 %v928_v63, %s1691_s6 }
 0x122   : > { %v1001_v3 = vsub.f32 %v1820_v19, %v985_v23  ;;  %v983_v59 = vpop.permute.xlu1 %982  ;;  %v1107_v7 = vsel %vm1103_vm6, %v1101_v30, 0.0 }
 0x123   : > { %v1022_v13 = vsel %vm1018_vm5, %v1007_v11, 0.0  ;;  %v1000_v56 = vsub.f32 %v1810_v17, %v983_v59  ;;  %v1108_v45 = vadd.f32 %v1107_v7, %v1106_v2 }
 0x124   : > { %v1023_v32 = vadd.f32 %v1022_v13, %v1021_v5  ;;  %v1009_v28 = vmul.f32 %v1999_v61, %v1001_v3 }
 0x125   : > { %v1008_v34 = vmul.f32 %v1990_v51, %v1000_v56  ;;  %v1155_v35 = vpop.permute.xlu0 %1154 }
 0x126   : > { %v1024_v36 = vsel %vm1018_vm5, %v1009_v28, 0.0  ;;  %v1178_v22 = vsub.f32 %v1794_v10, %v1155_v35  ;;  %v1090_v60 = vpop.permute.xlu1 %1089 }
 0x127   : > { %v1016_v4 = vsel %vm1010_vm3, %v1008_v34, 0.0  ;;  %v1098_v52 = vsub.f32 %v1810_v17, %v1090_v60  ;;  %v2127_v50 = vadd.f32 %v1024_v36, %v1023_v32 }
 0x128   : > { %v1186_v53 = vmul.f32 %v1966_v20, %v1178_v22  ;;  %v2130_v55 = vadd.f32 %v1016_v4, %v1015_v27 }
 0x129   : > { %v1102_v63 = vmul.f32 %v1990_v51, %v1098_v52  ;;  %v1159_v57 = vpop.permute.xlu0 %1158  ;;  %1030 = vrot.lane.b32.xlu0 %v2127_v50, %s1691_s6 }
 0x12a   : > { %v1180_v58 = vsub.f32 %v1796_v12, %v1159_v57  ;;  %v1157_v5 = vpop.permute.xlu1 %1156  ;;  %1028 = vrot.lane.b32.xlu1 %v2130_v55, %s1691_s6  ;;  %v1195_v30 = vsel %vm1194_vm8, %v1186_v53, 0.0 }
 0x12b   : > { %v1109_v6 = vsel %vm1103_vm6, %v1102_v63, 0.0  ;;  %v1179_v8 = vsub.f32 %v1800_v14, %v1157_v5 }
 0x12c   : > { %v2141_v11 = vadd.f32 %v1109_v6, %v1108_v45  ;;  %v1188_v23 = vmul.f32 %v1962_v9, %v1180_v58 }
 0x12d   : > { %v1187_v3 = vmul.f32 %v1968_v21, %v1179_v8  ;;  %v1163_v59 = vpop.permute.xlu0 %1162 }
 0x12e   : > { %v1196_v13 = vsel %vm1194_vm8, %v1188_v23, 0.0  ;;  %v1182_v56 = vsub.f32 %v1802_v15, %v1163_v59  ;;  %v1161_v27 = vpop.permute.xlu1 %1160  ;;  %v1112_v2 = vrot.slane %v2141_v11, 6 }
 0x12f   : > { %v1197_v32 = vadd.f32 %v1196_v13, %v1195_v30  ;;  %v1181_v28 = vsub.f32 %v1806_v16, %v1161_v27  ;;  %v1203_v34 = vsel %vm1202_vm9, %v1187_v3, 0.0  ;;  %v613_v27 = vsub.f32 %v1796_v12, %v1852_v25 }
 0x130   : > { %v1190_v7 = vmul.f32 %v1977_v31, %v1182_v56  ;;  %1113 = vrot.lane.b32.xlu1 %v1112_v2, %s1692_s7  ;;  %v612_v2 = vsub.f32 %v1794_v10, %v1845_v24  ;;  %v615_v25 = vsub.f32 %v1810_v17, %v1873_v38  ;;  %v554_v24 = vsub.f32 %v1800_v14, %v1885_v41 }
 0x131   : > { %v1189_v35 = vmul.f32 %v1972_v26, %v1181_v28  ;;  %v1167_v36 = vpop.permute.xlu0 %1166 }
 0x132   : > { %v1198_v22 = vsel %vm1194_vm8, %v1190_v7, 0.0  ;;  %v1184_v60 = vsub.f32 %v1810_v17, %v1167_v36  ;;  %v1165_v4 = vpop.permute.xlu1 %1164  ;;  %v616_v28 = vmul.f32 %v1966_v20, %v612_v2  ;;  %v614_v7 = vsub.f32 %v1802_v15, %v1863_v33 }
 0x133   : > { %v1199_v52 = vadd.f32 %v1198_v22, %v1197_v32  ;;  %v1204_v45 = vsel %vm1202_vm9, %v1189_v35, 0.0  ;;  %v1183_v53 = vsub.f32 %v1814_v18, %v1165_v4  ;;  %v617_v32 = vmul.f32 %v1962_v9, %v613_v27 }
 0x134   : > { %v1205_v63 = vadd.f32 %v1204_v45, %v1203_v34  ;;  %v1192_v57 = vmul.f32 %v1990_v51, %v1184_v60  ;;  %v553_v34 = vsub.f32 %v1794_v10, %v1870_v37  ;;  %v555_v35 = vsub.f32 %v1796_v12, %v1879_v40 }
 0x135   : > { %v1191_v58 = vmul.f32 %v1984_v39, %v1183_v53  ;;  %v622_v36 = vsel %vm620_vm10, %v617_v32, 0.0  ;;  %v621_v22 = vsel %vm620_vm10, %v616_v28, 0.0  ;;  %v618_v60 = vmul.f32 %v1977_v31, %v614_v7  ;;  %v2235_v32 = vld [vmem:[%s1760_s28] sm:$0xff]  ;;  %v2239_v7 = vld [vmem:[%s1760_s28 + $0x8] sm:$0x3] }
 0x136   : > { %v1200_v5 = vsel %vm1194_vm8, %v1192_v57, 0.0  ;;  %v1169_v6 = vpop.permute.xlu1 %1168  ;;  %v556_v33 = vsub.f32 %v1806_v16, %v1894_v43  ;;  %v561_v10 = vmul.f32 %v1966_v20, %v553_v34  ;;  %v563_v37 = vmul.f32 %v1962_v9, %v555_v35 }
 0x137   : > { %v1206_v8 = vsel %vm1202_vm9, %v1191_v58, 0.0  ;;  %v1185_v30 = vsub.f32 %v1820_v19, %v1169_v6  ;;  %v2162_v23 = vadd.f32 %v1200_v5, %v1199_v52  ;;  %v557_v12 = vsub.f32 %v1802_v15, %v1899_v44 }
 0x138   : > { %v1207_v3 = vadd.f32 %v1206_v8, %v1205_v63  ;;  %v623_v38 = vadd.f32 %v622_v36, %v621_v22  ;;  %v619_v14 = vmul.f32 %v1990_v51, %v615_v25  ;;  %v624_v40 = vsel %vm620_vm10, %v618_v60, 0.0 }
 0x139   : > { %v1193_v59 = vmul.f32 %v1999_v61, %v1185_v30  ;;  %1212 = vrot.lane.b32.xlu0 %v2162_v23, %s1692_s7  ;;  %v562_v41 = vmul.f32 %v1968_v21, %v554_v24  ;;  %v564_v4 = vmul.f32 %v1972_v26, %v556_v33  ;;  %v558_v16 = vsub.f32 %v1814_v18, %v1914_v48 }
 0x13a   : > { %v565_v43 = vmul.f32 %v1977_v31, %v557_v12  ;;  %v559_v9 = vsub.f32 %v1810_v17, %v1909_v46  ;;  %v571_v15 = vsel %vm569_vm11, %v563_v37, 0.0  ;;  %v570_v44 = vsel %vm569_vm11, %v561_v10, 0.0 }
 0x13b   : > { %v1208_v13 = vsel %vm1202_vm9, %v1193_v59, 0.0  ;;  %v625_v20 = vadd.f32 %v624_v40, %v623_v38  ;;  %v560_v52 = vsub.f32 %v1820_v19, %v1922_v49  ;;  %v578_v21 = vsel %vm577_vm12, %v562_v41, 0.0 }
 0x13c   : > { %v2168_v56 = vadd.f32 %v1208_v13, %v1207_v3  ;;  %v579_v26 = vsel %vm577_vm12, %v564_v4, 0.0  ;;  %v566_v45 = vmul.f32 %v1984_v39, %v558_v16  ;;  %v572_v18 = vadd.f32 %v571_v15, %v570_v44 }
 0x13d   : > { %v626_v48 = vsel %vm620_vm10, %v619_v14, 0.0  ;;  %v567_v31 = vmul.f32 %v1990_v51, %v559_v9  ;;  %v573_v17 = vsel %vm569_vm11, %v565_v43, 0.0  ;;  %v580_v46 = vadd.f32 %v579_v26, %v578_v21 }
 0x13e   : > { %1214 = vrot.lane.b32.xlu1 %v2168_v56, %s1692_s7  ;;  %v2216_v53 = vadd.f32 %v626_v48, %v625_v20  ;;  %v581_v63 = vsel %vm577_vm12, %v566_v45, 0.0  ;;  %v568_v19 = vmul.f32 %v1999_v61, %v560_v52  ;;  %v574_v49 = vadd.f32 %v573_v17, %v572_v18 }
 0x13f   : > { %v575_v57 = vsel %vm569_vm11, %v567_v31, 0.0  ;;  %v582_v58 = vadd.f32 %v581_v63, %v580_v46 }
 0x140   : > { %v583_v5 = vsel %vm577_vm12, %v568_v19, 0.0  ;;  %v2223_v51 = vadd.f32 %v575_v57, %v574_v49  ;;  %v629_v6 = vrot.slane %v2216_v53, 6 }
 0x141   : > { %v2227_v61 = vadd.f32 %v583_v5, %v582_v58 }
 0x142   : > { %v2232_v2 = vmax.f32 %v2223_v51, %v629_v6 }
 0x187   : > { %v482_v39 = vpop.permute.xlu0 %481 }
 0x188   : > { %vm484_vm13 = vcmp.lt.f32.partialorder %v1766_v0, %v482_v39  ;;  %v489_v3 = vpop.permute.xlu1 %488 }
 0x189   : > { %v491_v8 = vsel %vm484_vm13, %v1766_v0, %v482_v39  ;;  %v490_v59 = vsel %vm484_vm13, 6, %v489_v3 }
 0x18a   : > { %v493_v30 = vrot.slane %v491_v8, 6  ;;  %v497_v27 = vrot.slane %v490_v59, 6 }
 0x18b   : > { %v723_v13 = vpop.permute.xlu0 %722 }
 0x18c   : > { %vm495_vm14 = vcmp.lt.f32.partialorder %v1766_v0, %v493_v30  ;;  %vm496_vm15 = vcmp.lt.f32.partialorder %v1769_v1, %v493_v30  ;;  %v2243_v24 = vmax.f32 %v2232_v2, %v723_v13  ;;  %v725_v0 = vpop.permute.xlu1 %724  ;;  %v2246_v1 = vmax.f32 %v2227_v61, %v629_v6 }
 0x18d   : > { %v500_v28 = vsel %vm495_vm14, %v2235_v32, %v493_v30  ;;  %v501_v34 = vsel %vm496_vm15, %v2239_v7, %v493_v30  ;;  %v498_v35 = vsel %vm495_vm14, 7, %v497_v27  ;;  %v499_v25 = vsel %vm496_vm15, 7, %v497_v27 }
 0x18e   : > { %v505_v36 = vrot.slane %v501_v34, 1  ;;  %v504_v60 = vrot.slane %v500_v28, 1  ;;  %v515_v10 = vrot.slane %v498_v35, 1  ;;  %v516_v37 = vrot.slane %v499_v25, 1 }
 0x18f   : > { %v842_v22 = vpop.permute.xlu0 %841  ;;  %v2253_v12 = vmax.f32 %v2246_v1, %v725_v0  ;;  %v740_v43 = vrot.slane %v2243_v24, 1 }
 0x190   : > { %v2249_v33 = vmax.f32 %v2243_v24, %v842_v22  ;;  %509 = vrot.lane.b32.xlu1 %v505_v36, %s1692_s7  ;;  %v506_v38 = vsel %vm455_vm4, %v504_v60, %v505_v36  ;;  %v844_v40 = vpop.permute.xlu1 %843  ;;  %v517_v44 = vsel %vm455_vm4, %v515_v10, %v516_v37 }
 0x191   : > { %507 = vrot.lane.b32.xlu0 %v506_v38, %s1692_s7  ;;  %v2260_v41 = vmax.f32 %v2253_v12, %v844_v40  ;;  %v741_v20 = vrot.slane %v2253_v12, 1  ;;  %v1695_v38 = vmov 0.0  }
 0x192   : > { %v849_v14 = vsub.f32 %v2243_v24, %v2249_v33  ;;  %v859_v18 = vrot.slane %v2249_v33, 1 }
 0x193   : > { %v930_v4 = vpop.permute.xlu0 %929  ;;  %v850_v9 = vsub.f32 %v2253_v12, %v2260_v41  ;;  %v742_v26 = vsel %vm455_vm4, %v740_v43, %v741_v20  ;;  %v860_v45 = vrot.slane %v2260_v41, 1 }
 0x194   : > { %v2263_v16 = vmax.f32 %v2249_v33, %v930_v4  ;;  %520 = vrot.lane.b32.xlu1 %v516_v37, %s1692_s7  ;;  %v2270_v15 = vmax.f32 %v2260_v41, %v930_v4 }
 0x195   : > { %518 = vrot.lane.b32.xlu0 %v517_v44, %s1692_s7  ;;  %v861_v63 = vsel %vm455_vm4, %v859_v18, %v860_v45 }
 0x196   : > { %v934_v52 = vsub.f32 %v2249_v33, %v2263_v16  ;;  %v935_v21 = vsub.f32 %v2260_v41, %v2270_v15  ;;  %v944_v19 = vrot.slane %v2263_v16, 2  ;;  %v945_v49 = vrot.slane %v2270_v15, 2 }
 0x198   : > { %745 = vrot.lane.b32.xlu1 %v741_v20, %s1691_s6  ;;  %v946_v39 = vsel %vm413_vm1, %v944_v19, %v945_v49 }
 0x199   : > { %743 = vrot.lane.b32.xlu0 %v742_v26, %s1691_s6 }
 0x19b   : > { %v1031_v48 = vpop.permute.xlu0 %1030 }
 0x19c   : > { %v2285_v31 = vmax.f32 %v2270_v15, %v1031_v48  ;;  %v1029_v17 = vpop.permute.xlu1 %1028  ;;  %864 = vrot.lane.b32.xlu1 %v860_v45, %s1692_s7 }
 0x19d   : > { %v2289_v46 = vmax.f32 %v2263_v16, %v1029_v17  ;;  %862 = vrot.lane.b32.xlu0 %v861_v63, %s1692_s7 }
 0x19e   : > { %v1037_v57 = vsub.f32 %v2270_v15, %v2285_v31 }
 0x19f   : > { %v1036_v58 = vsub.f32 %v2263_v16, %v2289_v46 }
 0x1a0   : > { %1046 = vrot.lane.b32.xlu1 %v2289_v46, %s1692_s7  ;;  %v1040_v33 = vmul.f32 1.442695, %v1037_v57 }
 0x1a1   : > { %947 = vrot.lane.b32.xlu0 %v946_v39, %s1692_s7 }
 0x1a2   : > { %v1114_v5 = vpop.permute.xlu1 %1113 }
 0x1a3   : > { %v2304_v6 = vmax.f32 %v2289_v46, %v1114_v5  ;;  %v2307_v8 = vmax.f32 %v2285_v31, %v1114_v5 }
 0x1a5   : > { %v1118_v30 = vsub.f32 %v2289_v46, %v2304_v6  ;;  %v1119_v3 = vsub.f32 %v2285_v31, %v2307_v8  ;;  %v1128_v59 = vrot.slane %v2304_v6, 2  ;;  %v1129_v13 = vrot.slane %v2307_v8, 2  ;;  %1048 = vrot.lane.b32.xlu0 %v2285_v31, %s1692_s7 }
 0x1a7   : > { %v1130_v27 = vsel %vm413_vm1, %v1128_v59, %v1129_v13  ;;  %v1120_v41 = vmul.f32 1.442695, %v1118_v30  ;;  %v1122_v16 = vmul.f32 1.442695, %v1119_v3 }
 0x1a8   : > { %1131 = vrot.lane.b32.xlu1 %v1130_v27, %s1691_s6 }
 0x1ab   : > { %v1213_v28 = vpop.permute.xlu0 %1212 }
 0x1ac   : > { %v2320_v34 = vmax.f32 %v2304_v6, %v1213_v28 }
 0x1ae   : > { %1230 = vrot.lane.b32.xlu0 %v2320_v34, %s1691_s6 }
 0x1b0   : > { %v1215_v35 = vpop.permute.xlu1 %1214 }
 0x1b1   : > { %v2325_v25 = vmax.f32 %v2307_v8, %v1215_v35 }
 0x1b3   : > { %1232 = vrot.lane.b32.xlu1 %v2325_v25, %s1691_s6  ;;  %v1221_v15 = vsub.f32 %v2307_v8, %v2325_v25 }
 0x202   : > { %v510_v0 = vpop.permute.xlu1 %509 }
 0x203   : > { %v508_v36 = vpop.permute.xlu0 %507  ;;  %vm514_vm0 = vcmp.lt.f32.partialorder %v2239_v7, %v510_v0 }
 0x204   : > { %vm513_vm2 = vcmp.lt.f32.partialorder %v2235_v32, %v508_v36 }
 0x206   : > { %v521_v22 = vpop.permute.xlu1 %520 }
 0x207   : > { %v2330_v60 = vsel %vm514_vm0, 8, %v521_v22  ;;  %v519_v10 = vpop.permute.xlu0 %518 }
 0x208   : > { %vm1287_vm3 = vcmp.ne.s32.totalorder %v2330_v60, 8  ;;  %v2334_v37 = vsel %vm513_vm2, 8, %v519_v10  ;;  %vm769_vm12 = vcmp.eq.s32.totalorder %v2330_v60, 2  ;;  %vm961_vm0 = vcmp.eq.s32.totalorder %v2330_v60, 4 }
 0x209   : > { %v1507_v40 = vsel %vm1287_vm3, 1.0, %v1695_v38  ;;  %vm1286_vm5 = vcmp.ne.s32.totalorder %v2334_v37, 8  ;;  %vm585_vm10 = vcmp.eq.s32.totalorder %v2334_v37, 0  ;;  %vm653_vm11 = vcmp.eq.s32.totalorder %v2334_v37, 1 }
 0x20a   : > { %v746_v4 = vpop.permute.xlu1 %745  ;;  %v1295_v43 = vrot.slane %v1507_v40, 1  ;;  %v1506_v20 = vsel %vm1286_vm5, 1.0, %v1695_v38  ;;  %vm768_vm13 = vcmp.eq.s32.totalorder %v2334_v37, 2  ;;  %vm887_vm14 = vcmp.eq.s32.totalorder %v2334_v37, 3 }
 0x20b   : > { %v750_v44 = vsub.f32 %v2030_v54, %v746_v4  ;;  %v744_v26 = vpop.permute.xlu0 %743  ;;  %v1294_v45 = vrot.slane %v1506_v20, 1  ;;  %vm960_vm15 = vcmp.eq.s32.totalorder %v2334_v37, 4  ;;  %vm1068_vm2 = vcmp.eq.s32.totalorder %v2334_v37, 5 }
 0x20c   : > { %v749_v48 = vsub.f32 %v2019_v42, %v744_v26  ;;  %vm1069_vm3 = vcmp.eq.s32.totalorder %v2330_v60, 5  ;;  %vm1144_vm5 = vcmp.eq.s32.totalorder %v2334_v37, 6 }
 0x20d   : > { %v753_v18 = vmul.f32 1.442695, %v750_v44  ;;  %v1296_v63 = vsel %vm455_vm4, %v1294_v45, %v1295_v43 }
 0x20e   : > { %v865_v17 = vpop.permute.xlu1 %864  ;;  %v751_v19 = vmul.f32 1.442695, %v749_v48  ;;  %1297 = vrot.lane.b32.xlu0 %v1296_v63, %s1691_s6 }
 0x20f   : > { %1594 = vpow2.f32 %v753_v18  ;;  %v869_v49 = vsub.f32 %v2079_v62, %v865_v17  ;;  %v863_v39 = vpop.permute.xlu0 %862 }
 0x210   : > { %1596 = vpow2.f32 %v751_v19  ;;  %v868_v59 = vsub.f32 %v2074_v47, %v863_v39 }
 0x211   : > { %v872_v5 = vmul.f32 1.442695, %v869_v49 }
 0x212   : > { %v1047_v13 = vpop.permute.xlu1 %1046  ;;  %v870_v27 = vmul.f32 1.442695, %v868_v59 }
 0x213   : > { %1598 = vpow2.f32 %v872_v5  ;;  %v1052_v28 = vsub.f32 %v2130_v55, %v1047_v13  ;;  %v948_v35 = vpop.permute.xlu0 %947 }
 0x214   : > { %1600 = vpow2.f32 %v870_v27  ;;  %v950_v0 = vsub.f32 %v2092_v29, %v948_v35 }
 0x215   : > { %v1054_v22 = vmul.f32 1.442695, %v1052_v28 }
 0x216   : > { %v951_v36 = vmul.f32 1.442695, %v950_v0 }
 0x217   : > { %v1049_v10 = vpop.permute.xlu0 %1048 }
 0x218   : > { %1602 = vpow2.f32 %v951_v36  ;;  %v1053_v40 = vsub.f32 %v2127_v50, %v1049_v10 }
 0x219   : > { %v1595_v38 = vpop.eup %1594  ;;  %1604 = vpow2.f32 %v1054_v22 }
 0x21a   : > { %v758_v4 = vrot.slane %v1595_v38, 7  ;;  %v1132_v43 = vpop.permute.xlu1 %1131  ;;  %v1597_v44 = vpop.eup %1596  ;;  %v1056_v20 = vmul.f32 1.442695, %v1053_v40 }
 0x21b   : > { %v1134_v26 = vsub.f32 %v2141_v11, %v1132_v43  ;;  %v757_v45 = vrot.slane %v1597_v44, 7  ;;  %v962_v44 = vrot.slane %v2092_v29, 7 }
 0x21c   : > { %1606 = vpow2.f32 %v1056_v20  ;;  %v1071_v20 = vrot.slane %v2127_v50, 1  ;;  %v1146_v50 = vrot.slane %v2141_v11, 7  ;;  %v633_v11 = vsub.f32 %v2223_v51, %v2232_v2 }
 0x21d   : > { %v1599_v18 = vpop.eup %1598  ;;  %v1135_v48 = vmul.f32 1.442695, %v1134_v26  ;;  %760 = vrot.lane.b32.xlu1 %v757_v45, %s1692_s7  ;;  %v759_v63 = vsel %vm532_vm7, %v757_v45, %v758_v4  ;;  %v1070_v26 = vrot.slane %v2130_v55, 1  ;;  %v641_v55 = vrot.slane %v2232_v2, 2 }
 0x21e   : > { %v877_v17 = vrot.slane %v1599_v18, 7  ;;  %v1601_v19 = vpop.eup %1600  ;;  %762 = vrot.lane.b32.xlu0 %v759_v63, %s1692_s7  ;;  %v634_v18 = vsub.f32 %v2227_v61, %v2246_v1  ;;  %v731_v63 = vsub.f32 %v2246_v1, %v2253_v12  ;;  %v1038_v12 = vmul.f32 1.442695, %v1036_v58 }
 0x21f   : > { %1608 = vpow2.f32 %v1135_v48  ;;  %v876_v39 = vrot.slane %v1601_v19, 7  ;;  %v730_v48 = vsub.f32 %v2232_v2, %v2243_v24  ;;  %v938_v24 = vmul.f32 1.442695, %v935_v21 }
 0x220   : > { %v1231_v49 = vpop.permute.xlu0 %1230  ;;  %v637_v19 = vmul.f32 1.442695, %v634_v18  ;;  %v1220_v21 = vsub.f32 %v2304_v6, %v2320_v34 }
 0x221   : > { %v1236_v5 = vsub.f32 %v2162_v23, %v1231_v49  ;;  %879 = vrot.lane.b32.xlu1 %v876_v39, %s1691_s6  ;;  %v878_v59 = vsel %vm532_vm7, %v876_v39, %v877_v17  ;;  %v635_v17 = vmul.f32 1.442695, %v633_v11  ;;  %v732_v49 = vmul.f32 1.442695, %v730_v48 }
 0x222   : > { %v1603_v13 = vpop.eup %1602  ;;  %881 = vrot.lane.b32.xlu0 %v878_v59, %s1691_s6  ;;  %v734_v39 = vmul.f32 1.442695, %v731_v63  ;;  %v1222_v30 = vmul.f32 1.442695, %v1220_v21 }
 0x223   : > { %v1238_v27 = vmul.f32 1.442695, %v1236_v5  ;;  %v954_v28 = vrot.slane %v1603_v13, 6  ;;  %v1605_v0 = vpop.eup %1604  ;;  %v328_v5 = vld [vmem:[%s301_s15] sm:$0xff] }
 0x225   : > { %1610 = vpow2.f32 %v1238_v27  ;;  %v1233_v35 = vpop.permute.xlu1 %1232  ;;  %955 = vrot.lane.b32.xlu1 %v954_v28, %s1691_s6  ;;  %v853_v28 = vmul.f32 1.442695, %v850_v9 }
 0x226   : > { %v1237_v36 = vsub.f32 %v2168_v56, %v1233_v35  ;;  %1060 = vrot.lane.b32.xlu0 %v1605_v0, %s1691_s6  ;;  %v1607_v22 = vpop.eup %1606 }
 0x228   : > { %v1240_v10 = vmul.f32 1.442695, %v1237_v36  ;;  %v936_v36 = vmul.f32 1.442695, %v934_v52 }
 0x229   : > { %v1609_v38 = vpop.eup %1608  ;;  %1062 = vrot.lane.b32.xlu1 %v1607_v22, %s1691_s6 }
 0x22a   : > { %1612 = vpow2.f32 %v1240_v10  ;;  %v1138_v40 = vrot.slane %v1609_v38, 6 }
 0x22c   : > { %1139 = vrot.lane.b32.xlu0 %v1138_v40, %s1692_s7 }
 0x22f   : > { %v1611_v4 = vpop.eup %1610 }
 0x230   : > { %1244 = vrot.lane.b32.xlu1 %v1611_v4, %s1692_s7 }
 0x234   : > { %v1613_v43 = vpop.eup %1612  ;;  %770 = vrot.lane.b32.xlu1 %v2019_v42, %s1692_s7  ;;  %v1254_v42 = vrot.slane %v2162_v23, 1 }
 0x235   : > { %1246 = vrot.lane.b32.xlu0 %v1613_v43, %s1692_s7 }
 0x238   : > { %889 = vrot.lane.b32.xlu1 %v2074_v47, %s1691_s6  ;;  %v1255_v47 = vrot.slane %v2168_v56, 1 }
 0x239   : > { %772 = vrot.lane.b32.xlu0 %v2030_v54, %s1692_s7  ;;  %v1072_v54 = vsel %vm455_vm4, %v1070_v26, %v1071_v20 }
 0x23a   : > { %v1256_v29 = vsel %vm455_vm4, %v1254_v42, %v1255_v47  ;;  %v1224_v42 = vmul.f32 1.442695, %v1221_v15 }
 0x23c   : > { %963 = vrot.lane.b32.xlu1 %v962_v44, %s1691_s6 }
 0x23d   : > { %891 = vrot.lane.b32.xlu0 %v2079_v62, %s1691_s6  ;;  %v642_v62 = vrot.slane %v2246_v1, 2  ;;  %v851_v1 = vmul.f32 1.442695, %v849_v14 }
 0x23f   : > { %v643_v23 = vsel %vm413_vm1, %v641_v55, %v642_v62  ;;  %vm586_vm1 = vcmp.eq.s32.totalorder %v2330_v60, 0 }
 0x240   : > { %1075 = vrot.lane.b32.xlu1 %v1071_v20, %s1691_s6  ;;  %v645_v56 = vsub.f32 %v2216_v53, %v643_v23 }
 0x241   : > { %1073 = vrot.lane.b32.xlu0 %v1072_v54, %s1691_s6 }
 0x242   : > { %v646_v45 = vmul.f32 1.442695, %v645_v56 }
 0x244   : > { %1257 = vrot.lane.b32.xlu1 %v1256_v29, %s1692_s7  ;;  %1614 = vpow2.f32 %v646_v45 }
 0x245   : > { %1147 = vrot.lane.b32.xlu0 %v1146_v50, %s1692_s7  ;;  %1616 = vpow2.f32 %v635_v17 }
 0x246   : > { %1618 = vpow2.f32 %v637_v19 }
 0x247   : > { %1620 = vpow2.f32 %v732_v49 }
 0x248   : > { %1622 = vpow2.f32 %v734_v39 }
 0x249   : > { %1259 = vrot.lane.b32.xlu0 %v1255_v47, %s1692_s7  ;;  %1624 = vpow2.f32 %v851_v1 }
 0x24a   : > { %1626 = vpow2.f32 %v853_v28 }
 0x24b   : > { %1628 = vpow2.f32 %v936_v36 }
 0x24c   : > { %1630 = vpow2.f32 %v938_v24  ;;  %v589_v24 = vrot.slane %v2223_v51, 1 }
 0x24d   : > { %1632 = vpow2.f32 %v1038_v12 }
 0x24e   : > { %v1615_v13 = vpop.eup %1614  ;;  %1634 = vpow2.f32 %v1040_v33 }
 0x24f   : > { %v649_v35 = vrot.slane %v1615_v13, 6  ;;  %v1617_v0 = vpop.eup %1616  ;;  %1636 = vpow2.f32 %v1120_v41 }
 0x250   : > { %v1619_v22 = vpop.eup %1618  ;;  %1638 = vpow2.f32 %v1122_v16 }
 0x251   : > { %v651_v14 = vadd.f32 %v1617_v0, %v649_v35  ;;  %v1621_v10 = vpop.eup %1620  ;;  %v652_v9 = vadd.f32 %v1619_v22, %v649_v35  ;;  %1640 = vpow2.f32 %v1222_v30  ;;  %v590_v22 = vrot.slane %v2227_v61, 1 }
 0x252   : > { %v1623_v38 = vpop.eup %1622  ;;  %1642 = vpow2.f32 %v1224_v42 }
 0x253   : > { %v736_v52 = vmul.f32 %v1621_v10, %v651_v14  ;;  %v737_v4 = vmul.f32 %v1623_v38, %v652_v9  ;;  %v1625_v43 = vpop.eup %1624  ;;  %v655_v14 = vrot.slane %v2216_v53, 7  ;;  %v591_v38 = vsel %vm455_vm4, %v589_v24, %v590_v22 }
 0x254   : > { %v1627_v20 = vpop.eup %1626  ;;  %v594_v21 = vsel %vm585_vm10, %v591_v38, 0.0  ;;  %vm888_vm4 = vcmp.eq.s32.totalorder %v2330_v60, 3  ;;  %vm1253_vm10 = vcmp.eq.s32.totalorder %v2330_v60, 7 }
 0x255   : > { %v1629_v29 = vpop.eup %1628  ;;  %v657_v51 = vsel %vm653_vm11, %v655_v14, 0.0 }
 0x256   : > { %v1631_v3 = vpop.eup %1630 }
 0x257   : > { %v1633_v23 = vpop.eup %1632 }
 0x258   : > { %v1635_v45 = vpop.eup %1634 }
 0x259   : > { %v1637_v19 = vpop.eup %1636 }
 0x280   : > { %v1298_v2 = vpop.permute.xlu0 %1297 }
 0x281   : > { %v1300_v59 = vmul.f32 %v1298_v2, %v328_v5  ;;  %v1639_v5 = vpop.eup %1638 }
 0x282   : > { %v1641_v1 = vpop.eup %1640 }
 0x283   : > { %v1311_v27 = vrot.slane %v1300_v59, 6  ;;  %1327 = vst.msk [vmem:[%s317_s23] sm:$0xff] %vm1103_vm6, %v1300_v59  ;;  %v1643_v35 = vpop.eup %1642  ;;  %vm654_vm6 = vcmp.eq.s32.totalorder %v2330_v60, 1 }
 0x284   : > { %v658_v61 = vsel %vm654_vm6, %v655_v14, 0.0  ;;  %vm1252_vm6 = vcmp.eq.s32.totalorder %v2334_v37, 7 }
 0x285   : > { %1312 = vrot.lane.b32.xlu1 %v1311_v27, %s1692_s7 }
 0x28f   : > { %v761_v40 = vpop.permute.xlu1 %760 }
 0x290   : > { %v766_v57 = vadd.f32 %v761_v40, %v736_v52  ;;  %v763_v58 = vpop.permute.xlu0 %762  ;;  %v595_v52 = vsel %vm586_vm1, %v590_v22, 0.0  ;;  %vm1145_vm1 = vcmp.eq.s32.totalorder %v2330_v60, 6  ;;  %v1282_v22 = vmin.f32 %v2235_v32, 20.0 }
 0x291   : > { %v767_v44 = vadd.f32 %v763_v58, %v737_v4  ;;  %v660_v4 = vadd.f32 %v658_v61, %v595_v52 }
 0x292   : > { %v855_v46 = vmul.f32 %v1625_v43, %v766_v57  ;;  %v659_v57 = vadd.f32 %v657_v51, %v594_v21  ;;  %v1284_v24 = vmul.f32 0.05, %v1282_v22 }
 0x293   : > { %v880_v26 = vpop.permute.xlu1 %879  ;;  %v856_v6 = vmul.f32 %v1627_v20, %v767_v44 }
 0x294   : > { %v885_v47 = vadd.f32 %v880_v26, %v855_v46  ;;  %v882_v54 = vpop.permute.xlu0 %881 }
 0x295   : > { %v886_v31 = vadd.f32 %v882_v54, %v856_v6 }
 0x296   : > { %v940_v50 = vmul.f32 %v1629_v29, %v885_v47 }
 0x297   : > { %v941_v8 = vmul.f32 %v1631_v3, %v886_v31  ;;  %v956_v62 = vpop.permute.xlu1 %955 }
 0x298   : > { %v958_v55 = vadd.f32 %v956_v62, %v940_v50  ;;  %v1061_v11 = vpop.permute.xlu0 %1060 }
 0x299   : > { %v959_v56 = vadd.f32 %v956_v62, %v941_v8 }
 0x29a   : > { %v1042_v18 = vmul.f32 %v1633_v23, %v958_v55 }
 0x29b   : > { %v1063_v48 = vpop.permute.xlu1 %1062  ;;  %v1043_v17 = vmul.f32 %v1635_v45, %v959_v56 }
 0x29c   : > { %v1066_v63 = vadd.f32 %v1061_v11, %v1042_v18 }
 0x29d   : > { %v1067_v49 = vadd.f32 %v1063_v48, %v1043_v17 }
 0x29e   : > { %v1140_v39 = vpop.permute.xlu0 %1139  ;;  %v1124_v2 = vmul.f32 %v1637_v19, %v1066_v63 }
 0x29f   : > { %v1125_v59 = vmul.f32 %v1639_v5, %v1067_v49 }
 0x2a0   : > { %v1142_v13 = vadd.f32 %v1140_v39, %v1124_v2 }
 0x2a1   : > { %v1143_v27 = vadd.f32 %v1140_v39, %v1125_v59 }
 0x2a2   : > { %v1245_v28 = vpop.permute.xlu1 %1244  ;;  %v1226_v0 = vmul.f32 %v1641_v1, %v1142_v13 }
 0x2a3   : > { %v1227_v36 = vmul.f32 %v1643_v35, %v1143_v27 }
 0x2a4   : > { %v1250_v9 = vadd.f32 %v1245_v28, %v1226_v0 }
 0x2a6   : > { %v771_v10 = vpop.permute.xlu1 %770  ;;  %1644 = vlog2.f32 %v1250_v9 }
 0x2a7   : > { %v1247_v12 = vpop.permute.xlu0 %1246  ;;  %v776_v16 = vsel %vm768_vm13, %v771_v10, 0.0  ;;  %v1303_v10 = vrot.slane %v1284_v24, 7 }
 0x2a8   : > { %v1251_v41 = vadd.f32 %v1247_v12, %v1227_v36  ;;  %v778_v46 = vadd.f32 %v776_v16, %v659_v57  ;;  %v1283_v36 = vmin.f32 %v2239_v7, 20.0 }
 0x2aa   : > { %v890_v33 = vpop.permute.xlu1 %889  ;;  %1646 = vlog2.f32 %v1251_v41  ;;  %v1285_v60 = vmul.f32 0.05, %v1283_v36 }
 0x2ab   : > { %v773_v53 = vpop.permute.xlu0 %772  ;;  %v895_v44 = vsel %vm887_vm14, %v890_v33, 0.0 }
 0x2ac   : > { %v777_v40 = vsel %vm769_vm12, %v773_v53, 0.0  ;;  %v897_v42 = vadd.f32 %v895_v44, %v778_v46  ;;  %v1304_v14 = vrot.slane %v1285_v60, 7 }
 0x2ad   : > { %v779_v58 = vadd.f32 %v777_v40, %v660_v4 }
 0x2ae   : > { %v964_v15 = vpop.permute.xlu1 %963 }
 0x2af   : > { %v892_v43 = vpop.permute.xlu0 %891  ;;  %v966_v26 = vsel %vm960_vm15, %v964_v15, 0.0  ;;  %v967_v54 = vsel %vm961_vm0, %v964_v15, 0.0 }
 0x2b0   : > { %v896_v20 = vsel %vm888_vm4, %v892_v43, 0.0  ;;  %v968_v31 = vadd.f32 %v966_v26, %v897_v42  ;;  %v1645_v50 = vpop.eup %1644 }
 0x2b1   : > { %v898_v30 = vadd.f32 %v896_v20, %v779_v58  ;;  %v1268_v18 = vmul.f32 0.6931472, %v1645_v50 }
 0x2b2   : > { %v1076_v6 = vpop.permute.xlu1 %1075 }
 0x2b3   : > { %v1074_v47 = vpop.permute.xlu0 %1073  ;;  %v969_v3 = vadd.f32 %v967_v54, %v898_v30  ;;  %v1080_v8 = vsel %vm1069_vm3, %v1076_v6, 0.0  ;;  %v1271_v59 = vadd.f32 %v1268_v18, %v2320_v34  ;;  %v1305_v34 = vsel %vm532_vm7, %v1303_v10, %v1304_v14 }
 0x2b4   : > { %v1079_v29 = vsel %vm1068_vm2, %v1074_v47, 0.0  ;;  %v1647_v45 = vpop.eup %1646 }
 0x2b5   : > { %v1081_v62 = vadd.f32 %v1079_v29, %v968_v31  ;;  %v1082_v48 = vadd.f32 %v1080_v8, %v969_v3  ;;  %v1270_v5 = vmul.f32 0.6931472, %v1647_v45 }
 0x2b6   : > { %v1258_v55 = vpop.permute.xlu1 %1257 }
 0x2b7   : > { %v1148_v23 = vpop.permute.xlu0 %1147  ;;  %v1263_v63 = vsel %vm1252_vm6, %v1258_v55, 0.0  ;;  %v1272_v35 = vadd.f32 %v1270_v5, %v2325_v25 }
 0x2b8   : > { %v1150_v56 = vsel %vm1144_vm5, %v1148_v23, 0.0  ;;  %v1151_v11 = vsel %vm1145_vm1, %v1148_v23, 0.0 }
 0x2b9   : > { %v1152_v17 = vadd.f32 %v1150_v56, %v1081_v62  ;;  %v1153_v19 = vadd.f32 %v1151_v11, %v1082_v48 }
 0x2bb   : > { %v1265_v49 = vadd.f32 %v1263_v63, %v1152_v17  ;;  %v1260_v39 = vpop.permute.xlu0 %1259 }
 0x2bc   : > { %v1264_v2 = vsel %vm1253_vm10, %v1260_v39, 0.0 }
 0x2bd   : > { %v1275_v13 = vrot.slane %v1265_v49, 7  ;;  %v1266_v1 = vadd.f32 %v1264_v2, %v1153_v19 }
 0x2bf   : > { %v1276_v27 = vrot.slane %v1266_v1, 7  ;;  %v1280_v28 = vsub.f32 %v1271_v59, %v1275_v13 }
 0x2c1   : > { %v1277_v0 = vsel %vm532_vm7, %v1275_v13, %v1276_v27  ;;  %v1308_v12 = vmul.f32 %v1303_v10, %v1280_v28 }
 0x2c2   : > { %v1281_v37 = vsub.f32 %v1272_v35, %v1277_v0 }
 0x2c4   : > { %v1309_v9 = vmul.f32 %v1305_v34, %v1281_v37 }
 0x2f7   : > { %v1313_v38 = vpop.permute.xlu1 %1312 }
 0x2f8   : > { %v1315_v33 = vmul.f32 %v1313_v38, %v1308_v12  ;;  %v1316_v52 = vmul.f32 %v1313_v38, %v1309_v9 }
 0x2fa   : > { %1319 = vrot.lane.b32.xlu0 %v1315_v33, %s1691_s6  ;;  %1321 = vrot.lane.b32.xlu1 %v1316_v52, %s1691_s6 }
 0x36c   : > { %v1320_v32 = vpop.permute.xlu0 %1319  ;;  %v1322_v7 = vpop.permute.xlu1 %1321 }
 0x36d   : > { %1325 = vst.msk [vmem:[%s309_s26 - $0x2] sm:$0xfc] %vm1194_vm8, %v1320_v32 }
 0x36e   : > { %1326 = vst.msk [vmem:[%s309_s26 + $0x6] sm:$0x3] %vm1202_vm9, %v1322_v7 }
 0x36f PF: > { %s15_s19 = sadd.s32 1, %s1688_s19   ;;  %s2493_s15 = smov %s1680_s17 }
 0x370   : > { %p12_p8 = scmp.ge.s32.totalorder %s15_s19, 6   ;;  %s2494_s16 = smov %s1684_s18 }
 0x371   : > { %s2495_s17 = smov %s2498_s20  ;;  %s2496_s18 = smov %s2502_s21 }
 0x372   :  { %14 = sbr.rel (!%p12_p8) target bundleno = 3 (0x3), region = 80 }

</bundles_post_ra>
